<compile_context>
chip_gen: v7x
topology: tpu7x:2x2x1
jax: 0.10.0
libtpu: 0.0.40
codegen_flags: <defaults>
</compile_context>

<pallas_src>
import functools

import jax
import jax.numpy as jnp
from jax.experimental import pallas as pl
from jax.experimental.pallas import tpu as pltpu


def _round_up(x, m):
    return (x + m - 1) // m * m


def _phys_bytes(shape, dtype):
    """VMEM bytes of an array after (sublane,128) physical tiling of the last 2 dims."""
    isz = jnp.dtype(dtype).itemsize
    sub = 8 * max(1, 4 // isz)          # 8 rows for f32, 16 for bf16, 32 for int8
    if len(shape) < 2:
        return _round_up(int(jnp.prod(jnp.array(shape or (1,)))) * isz, 512)
    lead = 1
    for d in shape[:-2]:
        lead *= d
    return lead * _round_up(shape[-2], sub) * _round_up(shape[-1], 128) * isz


def _conv_bn_relu_kernel(x_ref, w_ref, shift_ref, o_ref, xpad_ref, *lhs_scratch,
                         K, H, W, Ho, Wo, stride, pad, fuse_taps):
    # x_ref:     (NB, H, W, Cin)        bf16 input block (un-padded)
    # w_ref:     fused:   (KKCp, TCO)   bf16 (BN scale folded in, rows zero-padded)
    #            per-kh:  (K, K*Cin, TCO) bf16
    # shift_ref: (1, TCO) f32           folded BN shift
    # o_ref:     (NB, Ho, Wo, CO_STORE) output block (CO_STORE = Cout if Cout<128)
    # xpad_ref:  (NB, H+2p, W+2p, Cin)  f32 VMEM scratch: zero-padded input block
    # lhs_scratch (fused only): (NB*Ho*Wo, KKCp) bf16 staged im2col lhs
    nb, _, _, cin = x_ref.shape
    m = nb * Ho * Wo

    def tap(kh, kw):
        if stride == 1:
            patch = xpad_ref[:, pl.ds(kh, Ho), pl.ds(kw, Wo), :]
        else:
            # TODO(synk): phase-pack (space-to-depth) stride>1 in the wrapper to
            # avoid strided sublane loads; this path is correctness-only.
            patch = xpad_ref[:, pl.ds(kh, Ho, stride), pl.ds(kw, Wo, stride), :]
        return patch.reshape(m, cin)

    # Fill the padded scratch (and the staged im2col lhs) once per batch block;
    # it is reused across all Cout tiles (the Cout grid axis is "arbitrary").
    @pl.when(pl.program_id(1) == 0)
    def _fill():
        # TODO(synk): zero only the halo ring; the full zero is kept because it is
        # off the steady-state (c > 0) path and has simple, known-good lowering.
        xpad_ref[...] = jnp.zeros_like(xpad_ref)
        xpad_ref[:, pl.ds(pad, H), pl.ds(pad, W), :] = (
            x_ref[...].astype(xpad_ref.dtype))
        if fuse_taps:
            lhs_ref = lhs_scratch[0]
            parts = [tap(kh, kw).astype(jnp.bfloat16)
                     for kh in range(K) for kw in range(K)]
            kkc = K * K * cin
            kkcp = lhs_ref.shape[-1]
            if kkcp > kkc:  # zero the lane pad so garbage never meets the MXU
                parts.append(jnp.zeros((m, kkcp - kkc), jnp.bfloat16))
            lhs_ref[...] = jnp.concatenate(parts, axis=-1)

    if fuse_taps:
        # Steady state: one lane-dense MXU matmul per Cout tile from the staged lhs.
        acc = jnp.dot(lhs_scratch[0][...], w_ref[...],
                      preferred_element_type=jnp.float32)
    else:
        # Large-Cin fallback: fuse the kw taps per kh (K dots, contraction K*Cin).
        # TODO(synk): stage a bf16 lhs for this path too once VMEM budget allows.
        acc = None
        for kh in range(K):
            lhs_kh = jnp.concatenate([tap(kh, kw) for kw in range(K)],
                                     axis=-1).astype(jnp.bfloat16)
            d = jnp.dot(lhs_kh, w_ref[kh], preferred_element_type=jnp.float32)
            acc = d if acc is None else acc + d

    y = jnp.maximum(acc + shift_ref[...], 0.0)        # BN scale folded into weights
    y = y.reshape(nb, Ho, Wo, y.shape[-1])
    tco_out = o_ref.shape[-1]
    if y.shape[-1] > tco_out:                          # drop MXU pad channels pre-store
        y = y[..., :tco_out]
    o_ref[...] = y.astype(o_ref.dtype)


def conv_bn_relu(x_nhwc, w_hwio, bn_scale, bn_shift, *, stride=1,
                 out_dtype=jnp.bfloat16):
    """Fused Conv2d(padding=(K-1)//2, stride) + folded BatchNorm + ReLU.

    x_nhwc: (N, H, W, Cin); w_hwio: (K, K, Cin, Cout); bn_*: (Cout,).
    Returns (N, Ho, Wo, Cout) in `out_dtype`.
    """
    N, H, W, Cin = x_nhwc.shape
    K = w_hwio.shape[0]
    Cout = w_hwio.shape[-1]
    p = (K - 1) // 2
    Ho = (H + 2 * p - K) // stride + 1
    Wo = (W + 2 * p - K) // stride + 1
    Hp, Wp = H + 2 * p, W + 2 * p

    x_bf = x_nhwc.astype(jnp.bfloat16)

    # Fold BN scale into the conv weights; only the shift remains in the epilogue.
    w_folded = (w_hwio.astype(jnp.float32)
                * bn_scale.astype(jnp.float32)[None, None, None, :])
    w_bf = w_folded.astype(jnp.bfloat16)

    small_cout = Cout < 128
    if small_cout:
        Coutp, cout_tile, n_co = 128, 128, 1
        out_ch = Cout                # store only the true channels (masked vst)
    else:
        Coutp = _round_up(Cout, 128)
        cout_tile = 256 if Coutp % 256 == 0 else 128
        n_co = Coutp // cout_tile
        out_ch = Coutp

    w_pad = jnp.pad(w_bf, ((0, 0), (0, 0), (0, 0), (0, Coutp - Cout)))
    shift2 = jnp.pad(bn_shift.astype(jnp.float32),
                     (0, Coutp - Cout)).reshape(1, Coutp)

    KKC = K * K * Cin
    fuse_taps = KKC <= 4096
    if fuse_taps:
        KKCp = _round_up(KKC, 128)
        w_in = jnp.pad(w_pad.reshape(KKC, Coutp), ((0, KKCp - KKC), (0, 0)))
        w_spec = pl.BlockSpec((KKCp, cout_tile), lambda n, c: (0, c))
    else:
        KKCp = KKC
        w_in = w_pad.reshape(K, K * Cin, Coutp)
        w_spec = pl.BlockSpec((K, K * Cin, cout_tile), lambda n, c: (0, 0, c))

    # Generation-aware VMEM budget (physical-tile-padded bytes, small-Cin aware).
    try:
        vmem_phys = int(getattr(pltpu.get_tpu_info(), "vmem_capacity_bytes",
                                64 * 1024 * 1024))
    except Exception:  # pragma: no cover - conservative fallback
        vmem_phys = 64 * 1024 * 1024
    vmem_limit = min(vmem_phys * 3 // 4, 112 * 1024 * 1024)
    budget = int(vmem_limit * 0.85)

    def working_set(nb):
        m = nb * Ho * Wo
        b = 2 * _phys_bytes((nb, H, W, Cin), jnp.bfloat16)        # in, double-buffered
        b += 2 * _phys_bytes((nb, Ho, Wo, out_ch), out_dtype)     # out, double-buffered
        b += _phys_bytes((nb, Hp, Wp, Cin), jnp.float32)          # padded scratch
        if fuse_taps:
            b += _phys_bytes((m, KKCp), jnp.bfloat16)             # staged im2col lhs
        b += 2 * _phys_bytes(tuple(w_in.shape[:-1]) + (cout_tile,), jnp.bfloat16)
        b += 2 * _phys_bytes((m, cout_tile), jnp.float32)         # acc/epilogue temps
        return b

    # Keep >= 2 parallel n-steps so both v7x TensorCores get work; then pick the
    # largest batch block that fits the budget.
    nb_cap = N if N == 1 else max(1, N // 2)
    NB = 1
    for cand in range(nb_cap, 0, -1):
        if N % cand == 0 and working_set(cand) <= budget:
            NB = cand
            break
    # TODO(synk): for images where even NB=1 exceeds the budget, add Ho-row tiling
    # with a (K-1)-row halo; whole-image blocks suffice at hourglass shapes here.

    kernel = functools.partial(
        _conv_bn_relu_kernel, K=K, H=H, W=W, Ho=Ho, Wo=Wo,
        stride=stride, pad=p, fuse_taps=fuse_taps)

    scratch = [pltpu.VMEM((NB, Hp, Wp, Cin), jnp.float32)]
    if fuse_taps:
        scratch.append(pltpu.VMEM((NB * Ho * Wo, KKCp), jnp.bfloat16))

    out = pl.pallas_call(
        kernel,
        out_shape=jax.ShapeDtypeStruct((N, Ho, Wo, out_ch), out_dtype),
        grid_spec=pltpu.PrefetchScalarGridSpec(
            num_scalar_prefetch=0,
            grid=(N // NB, n_co),                    # Cout axis innermost (reuse)
            in_specs=[
                pl.BlockSpec((NB, H, W, Cin), lambda n, c: (n, 0, 0, 0)),
                w_spec,
                pl.BlockSpec((1, cout_tile), lambda n, c: (0, c)),
            ],
            out_specs=pl.BlockSpec(
                (NB, Ho, Wo, Cout if small_cout else cout_tile),
                lambda n, c: (n, 0, 0, c)),
            scratch_shapes=scratch,
        ),
        compiler_params=pltpu.CompilerParams(
            # Cout axis must be "arbitrary": the padded/lhs scratches filled at
            # c == 0 are reused by the later Cout tiles of the same batch block.
            dimension_semantics=("parallel", "arbitrary"),
            vmem_limit_bytes=vmem_limit),
    )(x_bf, w_in, shift2)

    if out_ch != Cout:        # only when Cout >= 128 and not a multiple of 128
        out = out[..., :Cout]
    return out


if __name__ == "__main__":
    key = jax.random.PRNGKey(0)
    N, Cin, H, W = 2, 4, 16, 16
    Cout, K, stride = 8, 3, 1

    k1, k2, k3, k4, k5, k6 = jax.random.split(key, 6)
    # PyTorch NCHW input
    x_nchw = jax.random.normal(k1, (N, Cin, H, W), jnp.float32)
    # nn.Conv2d(in, out, k) weight: (Cout, Cin, K, K); bias=False since batchnorm=True
    w_oihw = jax.random.normal(k2, (Cout, Cin, K, K), jnp.float32) * 0.1
    # BatchNorm2d parameters / running stats (deterministic, non-trivial values)
    gamma = 1.0 + 0.1 * jax.random.normal(k3, (Cout,), jnp.float32)
    beta = 0.1 * jax.random.normal(k4, (Cout,), jnp.float32)
    running_mean = 0.1 * jax.random.normal(k5, (Cout,), jnp.float32)
    running_var = jax.random.uniform(k6, (Cout,), jnp.float32, minval=0.5, maxval=1.5)
    eps = 1e-5

    # TODO(synk): BatchNorm uses inference (running-stat) semantics folded into a
    # per-channel scale/shift; training-mode batch statistics are not computed.
    bn_scale = gamma / jnp.sqrt(running_var + eps)
    bn_shift = beta - running_mean * bn_scale

    # NCHW/OIHW -> NHWC/HWIO for the kernel
    x_nhwc = jnp.transpose(x_nchw, (0, 2, 3, 1))
    w_hwio = jnp.transpose(w_oihw, (2, 3, 1, 0))

    out_nhwc = conv_bn_relu(x_nhwc, w_hwio, bn_scale, bn_shift, stride=stride)
    out_nchw = jnp.transpose(out_nhwc, (0, 3, 1, 2))  # back to PyTorch NCHW
    jax.block_until_ready(out_nchw)

    # Reference (XLA) on the same bf16-rounded, BN-scale-folded operands.
    p = (K - 1) // 2
    x_ref32 = x_nhwc.astype(jnp.bfloat16).astype(jnp.float32)
    w_folded = w_hwio * bn_scale[None, None, None, :]
    w_ref32 = w_folded.astype(jnp.bfloat16).astype(jnp.float32)
    ref = jax.lax.conv_general_dilated(
        x_ref32, w_ref32, window_strides=(stride, stride),
        padding=[(p, p), (p, p)],
        dimension_numbers=("NHWC", "HWIO", "NHWC"))
    ref = jnp.maximum(ref + bn_shift, 0.0)

    assert out_nchw.shape == (N, Cout, H // stride, W // stride)
    err = jnp.max(jnp.abs(out_nhwc.astype(jnp.float32) - ref))
    assert jnp.allclose(out_nhwc.astype(jnp.float32), ref,
                        atol=3e-2, rtol=3e-2), float(err)
    print("KERNEL_OK")
</pallas_src>

<mosaic_0001>
module attributes {stable_mosaic.version = 11 : i64} {
  func.func @_conv_bn_relu_kernel(%arg0: i32, %arg1: i32, %arg2: memref<1x16x16x4xbf16, #tpu.memory_space<vmem>>, %arg3: memref<128x128xbf16, #tpu.memory_space<vmem>>, %arg4: memref<1x128xf32, #tpu.memory_space<vmem>>, %arg5: memref<1x16x16x8xbf16, #tpu.memory_space<vmem>>, %arg6: memref<1x18x18x4xf32, #tpu.memory_space<vmem>>, %arg7: memref<256x128xbf16, #tpu.memory_space<vmem>>) attributes {dimension_semantics = [#tpu.dimension_semantics<parallel>, #tpu.dimension_semantics<arbitrary>], iteration_bounds = array<i64: 2, 1>, scalar_prefetch = 0 : i64, scratch_operands = 2 : i64, tpu.core_type = #tpu.core_type<tc>, window_params = [{transform_indices = @transform_0, window_bounds = array<i64: 1, 16, 16, 4>}, {transform_indices = @transform_1, window_bounds = array<i64: 128, 128>}, {transform_indices = @transform_2, window_bounds = array<i64: 1, 128>}, {transform_indices = @transform_3, window_bounds = array<i64: 1, 16, 16, 8>}]} {
    %c0_i32 = arith.constant 0 : i32
    %0 = arith.cmpi eq, %arg1, %c0_i32 : i32
    %1 = arith.extui %0 : i1 to i32
    %c0_i32_0 = arith.constant 0 : i32
    %2 = arith.cmpi ne, %1, %c0_i32_0 : i32
    scf.if %2 {
      %cst_11 = arith.constant 0.000000e+00 : f32
      %15 = vector.broadcast %cst_11 : f32 to vector<1x18x18x4xf32>
      %c0_12 = arith.constant 0 : index
      %c0_13 = arith.constant 0 : index
      %c0_14 = arith.constant 0 : index
      %c0_15 = arith.constant 0 : index
      %16 = vector.load %arg6[%c0_12, %c0_13, %c0_14, %c0_15] : memref<1x18x18x4xf32, #tpu.memory_space<vmem>>, vector<1x18x18x4xf32>
      tpu.vector_store %arg6[%c0_12, %c0_13, %c0_14, %c0_15], %15 {strides = array<i32>} : memref<1x18x18x4xf32, #tpu.memory_space<vmem>>, vector<1x18x18x4xf32>,
      %c0_16 = arith.constant 0 : index
      %c0_17 = arith.constant 0 : index
      %c0_18 = arith.constant 0 : index
      %c0_19 = arith.constant 0 : index
      %17 = vector.load %arg2[%c0_16, %c0_17, %c0_18, %c0_19] : memref<1x16x16x4xbf16, #tpu.memory_space<vmem>>, vector<1x16x16x4xbf16>
      %18 = arith.extf %17 : vector<1x16x16x4xbf16> to vector<1x16x16x4xf32>
      %c0_20 = arith.constant 0 : index
      %c1 = arith.constant 1 : index
      %c1_21 = arith.constant 1 : index
      %c0_22 = arith.constant 0 : index
      %19 = vector.load %arg6[%c0_20, %c1, %c1_21, %c0_22] : memref<1x18x18x4xf32, #tpu.memory_space<vmem>>, vector<1x16x16x4xf32>
      tpu.vector_store %arg6[%c0_20, %c1, %c1_21, %c0_22], %18 {strides = array<i32>} : memref<1x18x18x4xf32, #tpu.memory_space<vmem>>, vector<1x16x16x4xf32>,
      %c0_23 = arith.constant 0 : index
      %c0_24 = arith.constant 0 : index
      %c0_25 = arith.constant 0 : index
      %c0_26 = arith.constant 0 : index
      %20 = vector.load %arg6[%c0_23, %c0_24, %c0_25, %c0_26] : memref<1x18x18x4xf32, #tpu.memory_space<vmem>>, vector<1x16x16x4xf32>
      %21 = vector.shape_cast %20 : vector<1x16x16x4xf32> to vector<256x4xf32>
      %22 = arith.truncf %21 : vector<256x4xf32> to vector<256x4xbf16>
      %c0_27 = arith.constant 0 : index
      %c0_28 = arith.constant 0 : index
      %c1_29 = arith.constant 1 : index
      %c0_30 = arith.constant 0 : index
      %23 = vector.load %arg6[%c0_27, %c0_28, %c1_29, %c0_30] : memref<1x18x18x4xf32, #tpu.memory_space<vmem>>, vector<1x16x16x4xf32>
      %24 = vector.shape_cast %23 : vector<1x16x16x4xf32> to vector<256x4xf32>
      %25 = arith.truncf %24 : vector<256x4xf32> to vector<256x4xbf16>
      %c0_31 = arith.constant 0 : index
      %c0_32 = arith.constant 0 : index
      %c2 = arith.constant 2 : index
      %c0_33 = arith.constant 0 : index
      %26 = vector.load %arg6[%c0_31, %c0_32, %c2, %c0_33] : memref<1x18x18x4xf32, #tpu.memory_space<vmem>>, vector<1x16x16x4xf32>
      %27 = vector.shape_cast %26 : vector<1x16x16x4xf32> to vector<256x4xf32>
      %28 = arith.truncf %27 : vector<256x4xf32> to vector<256x4xbf16>
      %c0_34 = arith.constant 0 : index
      %c1_35 = arith.constant 1 : index
      %c0_36 = arith.constant 0 : index
      %c0_37 = arith.constant 0 : index
      %29 = vector.load %arg6[%c0_34, %c1_35, %c0_36, %c0_37] : memref<1x18x18x4xf32, #tpu.memory_space<vmem>>, vector<1x16x16x4xf32>
      %30 = vector.shape_cast %29 : vector<1x16x16x4xf32> to vector<256x4xf32>
      %31 = arith.truncf %30 : vector<256x4xf32> to vector<256x4xbf16>
      %c0_38 = arith.constant 0 : index
      %c1_39 = arith.constant 1 : index
      %c1_40 = arith.constant 1 : index
      %c0_41 = arith.constant 0 : index
      %32 = vector.load %arg6[%c0_38, %c1_39, %c1_40, %c0_41] : memref<1x18x18x4xf32, #tpu.memory_space<vmem>>, vector<1x16x16x4xf32>
      %33 = vector.shape_cast %32 : vector<1x16x16x4xf32> to vector<256x4xf32>
      %34 = arith.truncf %33 : vector<256x4xf32> to vector<256x4xbf16>
      %c0_42 = arith.constant 0 : index
      %c1_43 = arith.constant 1 : index
      %c2_44 = arith.constant 2 : index
      %c0_45 = arith.constant 0 : index
      %35 = vector.load %arg6[%c0_42, %c1_43, %c2_44, %c0_45] : memref<1x18x18x4xf32, #tpu.memory_space<vmem>>, vector<1x16x16x4xf32>
      %36 = vector.shape_cast %35 : vector<1x16x16x4xf32> to vector<256x4xf32>
      %37 = arith.truncf %36 : vector<256x4xf32> to vector<256x4xbf16>
      %c0_46 = arith.constant 0 : index
      %c2_47 = arith.constant 2 : index
      %c0_48 = arith.constant 0 : index
      %c0_49 = arith.constant 0 : index
      %38 = vector.load %arg6[%c0_46, %c2_47, %c0_48, %c0_49] : memref<1x18x18x4xf32, #tpu.memory_space<vmem>>, vector<1x16x16x4xf32>
      %39 = vector.shape_cast %38 : vector<1x16x16x4xf32> to vector<256x4xf32>
      %40 = arith.truncf %39 : vector<256x4xf32> to vector<256x4xbf16>
      %c0_50 = arith.constant 0 : index
      %c2_51 = arith.constant 2 : index
      %c1_52 = arith.constant 1 : index
      %c0_53 = arith.constant 0 : index
      %41 = vector.load %arg6[%c0_50, %c2_51, %c1_52, %c0_53] : memref<1x18x18x4xf32, #tpu.memory_space<vmem>>, vector<1x16x16x4xf32>
      %42 = vector.shape_cast %41 : vector<1x16x16x4xf32> to vector<256x4xf32>
      %43 = arith.truncf %42 : vector<256x4xf32> to vector<256x4xbf16>
      %c0_54 = arith.constant 0 : index
      %c2_55 = arith.constant 2 : index
      %c2_56 = arith.constant 2 : index
      %c0_57 = arith.constant 0 : index
      %44 = vector.load %arg6[%c0_54, %c2_55, %c2_56, %c0_57] : memref<1x18x18x4xf32, #tpu.memory_space<vmem>>, vector<1x16x16x4xf32>
      %45 = vector.shape_cast %44 : vector<1x16x16x4xf32> to vector<256x4xf32>
      %46 = arith.truncf %45 : vector<256x4xf32> to vector<256x4xbf16>
      %cst_58 = arith.constant 0.000000e+00 : bf16
      %47 = vector.broadcast %cst_58 : bf16 to vector<256x92xbf16>
      %48 = tpu.concatenate %22, %25, %28, %31, %34, %37, %40, %43, %46, %47 in 1 : vector<256x4xbf16>, vector<256x4xbf16>, vector<256x4xbf16>, vector<256x4xbf16>, vector<256x4xbf16>, vector<256x4xbf16>, vector<256x4xbf16>, vector<256x4xbf16>, vector<256x4xbf16>, vector<256x92xbf16> -> vector<256x128xbf16>
      %c0_59 = arith.constant 0 : index
      %c0_60 = arith.constant 0 : index
      %49 = vector.load %arg7[%c0_59, %c0_60] : memref<256x128xbf16, #tpu.memory_space<vmem>>, vector<256x128xbf16>
      tpu.vector_store %arg7[%c0_59, %c0_60], %48 {strides = array<i32>} : memref<256x128xbf16, #tpu.memory_space<vmem>>, vector<256x128xbf16>,
    } else {
    }
    %c0 = arith.constant 0 : index
    %c0_1 = arith.constant 0 : index
    %3 = vector.load %arg7[%c0, %c0_1] : memref<256x128xbf16, #tpu.memory_space<vmem>>, vector<256x128xbf16>
    %c0_2 = arith.constant 0 : index
    %c0_3 = arith.constant 0 : index
    %4 = vector.load %arg3[%c0_2, %c0_3] : memref<128x128xbf16, #tpu.memory_space<vmem>>, vector<128x128xbf16>
    %cst = arith.constant dense<0.000000e+00> : vector<256x128xf32>
    %5 = tpu.matmul %3, %4, %cst {dimension_numbers = #tpu.dot_dimension_numbers<[1], [0], [0], [1], [0, 0, 1, 1], [], []>} : vector<256x128xbf16>, vector<128x128xbf16>, vector<256x128xf32> -> vector<256x128xf32>
    %c0_4 = arith.constant 0 : index
    %c0_5 = arith.constant 0 : index
    %6 = vector.load %arg4[%c0_4, %c0_5] : memref<1x128xf32, #tpu.memory_space<vmem>>, vector<1x128xf32>
    %7 = vector.broadcast %6 : vector<1x128xf32> to vector<256x128xf32>
    %8 = arith.addf %5, %7 : vector<256x128xf32>
    %cst_6 = arith.constant 0.000000e+00 : f32
    %9 = vector.broadcast %cst_6 : f32 to vector<256x128xf32>
    %10 = arith.maximumf %8, %9 : vector<256x128xf32>
    %11 = vector.shape_cast %10 : vector<256x128xf32> to vector<1x16x16x128xf32>
    %12 = vector.extract_strided_slice %11 {offsets = [0, 0, 0, 0], sizes = [1, 16, 16, 8], strides = [1, 1, 1, 1]} : vector<1x16x16x128xf32> to vector<1x16x16x8xf32>
    %13 = arith.truncf %12 : vector<1x16x16x8xf32> to vector<1x16x16x8xbf16>
    %c0_7 = arith.constant 0 : index
    %c0_8 = arith.constant 0 : index
    %c0_9 = arith.constant 0 : index
    %c0_10 = arith.constant 0 : index
    %14 = vector.load %arg5[%c0_7, %c0_8, %c0_9, %c0_10] : memref<1x16x16x8xbf16, #tpu.memory_space<vmem>>, vector<1x16x16x8xbf16>
    tpu.vector_store %arg5[%c0_7, %c0_8, %c0_9, %c0_10], %13 {strides = array<i32>} : memref<1x16x16x8xbf16, #tpu.memory_space<vmem>>, vector<1x16x16x8xbf16>,
    return
  }
  func.func @transform_0(%arg0: i32, %arg1: i32) -> (i32, i32, i32, i32) {
    %c0_i32 = arith.constant 0 : i32
    %c0_i32_0 = arith.constant 0 : i32
    %c0_i32_1 = arith.constant 0 : i32
    %c0_i32_2 = arith.constant 0 : i32
    return %arg0, %c0_i32, %c0_i32_0, %c0_i32_1 : i32, i32, i32, i32
  }
  func.func @transform_1(%arg0: i32, %arg1: i32) -> (i32, i32) {
    %c0_i32 = arith.constant 0 : i32
    %c0_i32_0 = arith.constant 0 : i32
    return %c0_i32, %arg1 : i32, i32
  }
  func.func @transform_2(%arg0: i32, %arg1: i32) -> (i32, i32) {
    %c0_i32 = arith.constant 0 : i32
    %c0_i32_0 = arith.constant 0 : i32
    return %c0_i32, %arg1 : i32, i32
  }
  func.func @transform_3(%arg0: i32, %arg1: i32) -> (i32, i32, i32, i32) {
    %c0_i32 = arith.constant 0 : i32
    %c0_i32_0 = arith.constant 0 : i32
    %c0_i32_1 = arith.constant 0 : i32
    return %arg0, %c0_i32, %c0_i32_0, %arg1 : i32, i32, i32, i32
  }
}

</mosaic_0001>

<bundles_post_ra>
// kernel: tpu_custom_call.1
= control target key start
LH: loop header
LB: loop body
LE: loop exit
PB: predicated region body
PF: predicated region fallthrough
CT: control target
= control target key end

     0   :  { %s2437_s12 = smov 0   ;;  %s2439_s13 = smov 0   ;;  %s3231_s0 = inlined_call_operand.vmem [shape: bf16[2,16,16,4], index: 0, kind: input, shape index: {}]   ;;  %s3232_s1 = inlined_call_operand.vmem [shape: bf16[128,128], index: 1, kind: input, shape index: {}]   ;;  %s3233_s2 = inlined_call_operand.vmem [shape: f32[1,128], index: 2, kind: input, shape index: {}]   ;;  %s3234_s3 = inlined_call_operand.vmem [shape: bf16[2,16,16,8], index: 3, kind: output, shape index: {}]  }
   0x1   :  { %s2441_s14 = smov 0  }
   0x2 LB: > { %s25_s15 = sadd.s32 1, %s2402_s13  ;;  %p2078_p0 = scmp.ge.s32.totalorder %s2406_s14, 1  ;;  %s2406_s14 = sphi %s2441_s14, %s13_s14   ;;  %s2402_s13 = sphi %s2439_s13, %s3236_s13   ;;  %s2398_s12 = sphi %s2437_s12, %s3235_s12  }
   0x3   : > { %p27_p1 = scmp.ge.s32.totalorder %s25_s15, 2  ;;  %p168_p2 = scmp.lt.s32.totalorder %s2406_s14, 3 }
   0x5   : > { %s3238_s15 = smov (%p27_p1, %s25_s15), 0  ;;  %p169_p3 = pnand %p2078_p0, %p168_p2 }
   0x6   : > { %vm227_vm0 = vcmask (!%p169_p3), 31744   ;;  %vm230_vm1 = vcmask (!%p169_p3), 25600   ;;  %v2408_v0 = vmov (!%p169_p3), 0.0   ;;  %p202_p4 = scmp.lt.s32.totalorder (!%p169_p3), %s2398_s12, 1  ;;  %s2409_s20 = smov (!%p169_p3), 4   ;;  %vm1245_vm2 = vcmask (!%p169_p3), 64512  }
   0x7   : > { %172 = sbr.rel (%p169_p3) target bundleno = 635 (0x27b), region = 32  ;;  %228 = vst.msk [vmem:[#allocation2] sm:$0xff] (!%p169_p3), %vm227_vm0, %v2408_v0  ;;  %229 = vst.msk [vmem:[#allocation2 + $0x8] sm:$0xff] (!%p169_p3), %vm227_vm0, %v2408_v0  ;;  %s2410_s21 = smov (!%p169_p3), 8   ;;  %vm1278_vm3 = vcmask (!%p169_p3), 97280   ;;  %vm1311_vm4 = vcmask (!%p169_p3), 130048  }
   0x8   : > { %231 = vst.msk [vmem:[#allocation2 + $0x10] sm:$0x3] (!%p169_p3), %vm230_vm1, %v2408_v0  ;;  %234 = vst.msk [vmem:[#allocation2 + $0x28] sm:$0x3] (!%p169_p3), %vm230_vm1, %v2408_v0  ;;  %s2411_s22 = smov (!%p169_p3), 12   ;;  %s2412_s23 = smov (!%p169_p3), 16  }
   0x9   : > { %232 = vst.msk [vmem:[#allocation2 + $0x18] sm:$0xff] (!%p169_p3), %vm227_vm0, %v2408_v0  ;;  %233 = vst.msk [vmem:[#allocation2 + $0x20] sm:$0xff] (!%p169_p3), %vm227_vm0, %v2408_v0  ;;  %s2413_s30 = smov (!%p169_p3), 20   ;;  %s2414_s8 = smov (!%p169_p3), 24   ;;  %vm1344_vm5 = vcmask (!%p169_p3), 162816   ;;  %vm1377_vm6 = vcmask (!%p169_p3), 195584  }
   0xa   : > { %235 = vst.msk [vmem:[#allocation2 + $0x30] sm:$0xff] (!%p169_p3), %vm227_vm0, %v2408_v0  ;;  %236 = vst.msk [vmem:[#allocation2 + $0x38] sm:$0xff] (!%p169_p3), %vm227_vm0, %v2408_v0  ;;  %s2415_s18 = smov (!%p169_p3), 28   ;;  %s2416_s26 = smov (!%p169_p3), 32   ;;  %vm1410_vm7 = vcmask (!%p169_p3), 228352   ;;  %vm1443_vm8 = vcmask (!%p169_p3), 261120  }
   0xb   : > { %237 = vst.msk [vmem:[#allocation2 + $0x40] sm:$0x3] (!%p169_p3), %vm230_vm1, %v2408_v0  ;;  %240 = vst.msk [vmem:[#allocation2 + $0x58] sm:$0x3] (!%p169_p3), %vm230_vm1, %v2408_v0  ;;  %vm1476_vm9 = vcmask (!%p169_p3), 293888   ;;  %vm1934_vm10 = vcmask (!%p169_p3), 60416  }
   0xc   : > { %238 = vst.msk [vmem:[#allocation2 + $0x48] sm:$0xff] (!%p169_p3), %vm227_vm0, %v2408_v0  ;;  %239 = vst.msk [vmem:[#allocation2 + $0x50] sm:$0xff] (!%p169_p3), %vm227_vm0, %v2408_v0 }
   0xd   : > { %241 = vst.msk [vmem:[#allocation2 + $0x60] sm:$0xff] (!%p169_p3), %vm227_vm0, %v2408_v0  ;;  %242 = vst.msk [vmem:[#allocation2 + $0x68] sm:$0xff] (!%p169_p3), %vm227_vm0, %v2408_v0 }
   0xe   : > { %243 = vst.msk [vmem:[#allocation2 + $0x70] sm:$0x3] %vm230_vm1, %v2408_v0  ;;  %246 = vst.msk [vmem:[#allocation2 + $0x88] sm:$0x3] %vm230_vm1, %v2408_v0  ;;  %s3240_s12 = smov (!%p202_p4, %s2398_s12), 1  ;;  %v428_v4 = vld [vmem:[#allocation2 + $0x1] sm:$0xff] }
   0xf   : > { %244 = vst.msk [vmem:[#allocation2 + $0x78] sm:$0xff] %vm227_vm0, %v2408_v0  ;;  %245 = vst.msk [vmem:[#allocation2 + $0x80] sm:$0xff] %vm227_vm0, %v2408_v0  ;;  %s2126_s16 = sshll.u32 %s3240_s12, 7  ;;  %v429_v5 = vld [vmem:[#allocation2 + $0x9] sm:$0xff] }
  0x10   : > { %247 = vst.msk [vmem:[#allocation2 + $0x90] sm:$0xff] %vm227_vm0, %v2408_v0  ;;  %248 = vst.msk [vmem:[#allocation2 + $0x98] sm:$0xff] %vm227_vm0, %v2408_v0  ;;  %s2521_s19 = scalar_lea.vmem %s3231_s0, %s2126_s16  ;;  %v476_v6 = vld [vmem:[#allocation2 + $0x2] sm:$0xff]  ;;  %v460_v11 = vpack.c.bf16 %v429_v5, %v428_v4  ;;  %v477_v12 = vld [vmem:[#allocation2 + $0xa] sm:$0xff] }
  0x11   : > { %249 = vst.msk [vmem:[#allocation2 + $0xa0] sm:$0x3] %vm230_vm1, %v2408_v0  ;;  %252 = vst.msk [vmem:[#allocation2 + $0xb8] sm:$0x3] %vm230_vm1, %v2408_v0  ;;  %v2230_v1 = vld [vmem:[%s2521_s19 + $0x38] sm:$0xff]   ;;  %v2161_v2 = vld [vmem:[%s2521_s19] sm:$0xff]   ;;  %v508_v17 = vpack.c.bf16 %v477_v12, %v476_v6 }
  0x12   : > { %250 = vst.msk [vmem:[#allocation2 + $0xa8] sm:$0xff] %vm227_vm0, %v2408_v0  ;;  %251 = vst.msk [vmem:[#allocation2 + $0xb0] sm:$0xff] %vm227_vm0, %v2408_v0  ;;  %v2231_v3 = vld [vmem:[%s2521_s19 + $0x40] sm:$0xff]   ;;  %v2190_v7 = vunpack.c.l.bf16 %v2230_v1  ;;  %v2191_v8 = vunpack.c.h.bf16 %v2230_v1  ;;  %v2162_v9 = vunpack.c.l.bf16 %v2161_v2  ;;  %v2163_v10 = vunpack.c.h.bf16 %v2161_v2  ;;  %v2224_v15 = vld [vmem:[%s2521_s19 + $0x8] sm:$0xff]   ;;  %829 = vrot.lane.b32.xlu0 %v460_v11, %s2409_s20 }
  0x13   : > { %253 = vst.msk [vmem:[#allocation2 + $0xc0] sm:$0xff] %vm227_vm0, %v2408_v0  ;;  %254 = vst.msk [vmem:[#allocation2 + $0xc8] sm:$0xff] %vm227_vm0, %v2408_v0  ;;  %v2194_v13 = vunpack.c.l.bf16 %v2231_v3  ;;  %v2195_v14 = vunpack.c.h.bf16 %v2231_v3  ;;  %v2232_v16 = vld [vmem:[%s2521_s19 + $0x48] sm:$0xff]   ;;  %v2166_v18 = vunpack.c.l.bf16 %v2224_v15  ;;  %v2167_v19 = vunpack.c.h.bf16 %v2224_v15  ;;  %v2225_v21 = vld [vmem:[%s2521_s19 + $0x10] sm:$0xff]  }
  0x14   : > { %255 = vst.msk [vmem:[#allocation2 + $0xd0] sm:$0x3] %vm230_vm1, %v2408_v0  ;;  %258 = vst.msk [vmem:[#allocation2 + $0xe8] sm:$0x3] %vm230_vm1, %v2408_v0  ;;  %v2198_v20 = vunpack.c.l.bf16 %v2232_v16  ;;  %v2233_v22 = vld [vmem:[%s2521_s19 + $0x50] sm:$0xff]   ;;  %v2226_v23 = vld [vmem:[%s2521_s19 + $0x18] sm:$0xff]   ;;  %v2199_v24 = vunpack.c.h.bf16 %v2232_v16  ;;  %v2170_v25 = vunpack.c.l.bf16 %v2225_v21  ;;  %v2171_v26 = vunpack.c.h.bf16 %v2225_v21 }
  0x15   : > { %256 = vst.msk [vmem:[#allocation2 + $0xd8] sm:$0xff] %vm227_vm0, %v2408_v0  ;;  %257 = vst.msk [vmem:[#allocation2 + $0xe0] sm:$0xff] %vm227_vm0, %v2408_v0  ;;  %v2202_v27 = vunpack.c.l.bf16 %v2233_v22  ;;  %v2234_v28 = vld [vmem:[%s2521_s19 + $0x58] sm:$0xff]   ;;  %v2227_v29 = vld [vmem:[%s2521_s19 + $0x20] sm:$0xff]   ;;  %v2203_v30 = vunpack.c.h.bf16 %v2233_v22  ;;  %v2174_v31 = vunpack.c.l.bf16 %v2226_v23  ;;  %v2175_v32 = vunpack.c.h.bf16 %v2226_v23 }
  0x16   : > { %259 = vst.msk [vmem:[#allocation2 + $0xf0] sm:$0xff] %vm227_vm0, %v2408_v0  ;;  %260 = vst.msk [vmem:[#allocation2 + $0xf8] sm:$0xff] %vm227_vm0, %v2408_v0  ;;  %v2206_v33 = vunpack.c.l.bf16 %v2234_v28  ;;  %v2235_v34 = vld [vmem:[%s2521_s19 + $0x60] sm:$0xff]   ;;  %v2207_v35 = vunpack.c.h.bf16 %v2234_v28  ;;  %v2178_v36 = vunpack.c.l.bf16 %v2227_v29  ;;  %v2179_v37 = vunpack.c.h.bf16 %v2227_v29  ;;  %877 = vrot.lane.b32.xlu0 %v508_v17, %s2410_s21  ;;  %v2377_v11 = vld [vmem:[%s3232_s1 + $0x8] sm:$0xff]  }
  0x17   : > { %261 = vst.msk [vmem:[#allocation2 + $0x100] sm:$0x3] %vm230_vm1, %v2408_v0  ;;  %264 = vst.msk [vmem:[#allocation2 + $0x118] sm:$0x3] %vm230_vm1, %v2408_v0  ;;  %v2210_v38 = vunpack.c.l.bf16 %v2235_v34  ;;  %v2211_v39 = vunpack.c.h.bf16 %v2235_v34  ;;  %v2378_v21 = vld [vmem:[%s3232_s1 + $0x10] sm:$0xff]  }
  0x18   : > { %262 = vst.msk [vmem:[#allocation2 + $0x108] sm:$0xff] %vm227_vm0, %v2408_v0  ;;  %263 = vst.msk [vmem:[#allocation2 + $0x110] sm:$0xff] %vm227_vm0, %v2408_v0  ;;  %v2229_v23 = vld [vmem:[%s2521_s19 + $0x30] sm:$0xff]  }
  0x19   : > { %265 = vst.msk [vmem:[#allocation2 + $0x120] sm:$0xff] %vm227_vm0, %v2408_v0  ;;  %266 = vst.msk [vmem:[#allocation2 + $0x128] sm:$0xff] %vm227_vm0, %v2408_v0  ;;  %v2237_v34 = vld [vmem:[%s2521_s19 + $0x70] sm:$0xff]  }
  0x1a   : > { %267 = vst.msk [vmem:[#allocation2 + $0x130] sm:$0x3] %vm230_vm1, %v2408_v0  ;;  %270 = vst.msk [vmem:[#allocation2 + $0x148] sm:$0x3] %vm230_vm1, %v2408_v0 }
  0x1b   : > { %268 = vst.msk [vmem:[#allocation2 + $0x138] sm:$0xff] %vm227_vm0, %v2408_v0  ;;  %269 = vst.msk [vmem:[#allocation2 + $0x140] sm:$0xff] %vm227_vm0, %v2408_v0 }
  0x1c   : > { %271 = vst.msk [vmem:[#allocation2 + $0x150] sm:$0xff] %vm227_vm0, %v2408_v0  ;;  %272 = vst.msk [vmem:[#allocation2 + $0x158] sm:$0xff] %vm227_vm0, %v2408_v0 }
  0x1d   : > { %273 = vst.msk [vmem:[#allocation2 + $0x160] sm:$0x3] %vm230_vm1, %v2408_v0  ;;  %276 = vst.msk [vmem:[#allocation2 + $0x178] sm:$0x3] %vm230_vm1, %v2408_v0 }
  0x1e   : > { %274 = vst.msk [vmem:[#allocation2 + $0x168] sm:$0xff] %vm227_vm0, %v2408_v0  ;;  %275 = vst.msk [vmem:[#allocation2 + $0x170] sm:$0xff] %vm227_vm0, %v2408_v0 }
  0x1f   : > { %277 = vst.msk [vmem:[#allocation2 + $0x180] sm:$0xff] %vm227_vm0, %v2408_v0  ;;  %278 = vst.msk [vmem:[#allocation2 + $0x188] sm:$0xff] %vm227_vm0, %v2408_v0 }
  0x20   : > { %279 = vst.msk [vmem:[#allocation2 + $0x190] sm:$0x3] %vm230_vm1, %v2408_v0  ;;  %282 = vst.msk [vmem:[#allocation2 + $0x1a8] sm:$0x3] %vm230_vm1, %v2408_v0 }
  0x21   : > { %280 = vst.msk [vmem:[#allocation2 + $0x198] sm:$0xff] %vm227_vm0, %v2408_v0  ;;  %281 = vst.msk [vmem:[#allocation2 + $0x1a0] sm:$0xff] %vm227_vm0, %v2408_v0 }
  0x22   : > { %362 = vst.msk [vmem:[#allocation2 + $0xc1] sm:$0xff] %vm227_vm0, %v2190_v7  ;;  %363 = vst.msk [vmem:[#allocation2 + $0xc9] sm:$0xff] %vm227_vm0, %v2191_v8 }
  0x23   : > { %348 = vst.msk [vmem:[#allocation2 + $0x19] sm:$0xff] %vm227_vm0, %v2162_v9  ;;  %349 = vst.msk [vmem:[#allocation2 + $0x21] sm:$0xff] %vm227_vm0, %v2163_v10  ;;  %v2376_v9 = vld [vmem:[%s3232_s1] sm:$0xff]   ;;  %v2228_v10 = vld [vmem:[%s2521_s19 + $0x28] sm:$0xff]  }
  0x24   : > { %364 = vst.msk [vmem:[#allocation2 + $0xd9] sm:$0xff] %vm227_vm0, %v2194_v13  ;;  %365 = vst.msk [vmem:[#allocation2 + $0xe1] sm:$0xff] %vm227_vm0, %v2195_v14  ;;  %v2182_v12 = vunpack.c.l.bf16 %v2228_v10  ;;  %v2183_v13 = vunpack.c.h.bf16 %v2228_v10  ;;  %v2236_v14 = vld [vmem:[%s2521_s19 + $0x68] sm:$0xff]   ;;  %2279 = vmatprep.subr.bf16.mxu0 %v2376_v9  ;;  %2327 = vmatprep.subr.bf16.mxu1 %v2376_v9 }
  0x25   : > { %350 = vst.msk [vmem:[#allocation2 + $0x31] sm:$0xff] %vm227_vm0, %v2166_v18  ;;  %351 = vst.msk [vmem:[#allocation2 + $0x39] sm:$0xff] %vm227_vm0, %v2167_v19  ;;  %v2214_v17 = vunpack.c.l.bf16 %v2236_v14  ;;  %v2215_v18 = vunpack.c.h.bf16 %v2236_v14  ;;  %2280 = vmatpush3.bf16.msra.mxu0 %v2376_v9  ;;  %2335 = vmatpush3.bf16.msra.mxu1 %v2376_v9 }
  0x26   : > { %366 = vst.msk [vmem:[#allocation2 + $0xf1] sm:$0xff] %vm227_vm0, %v2198_v20  ;;  %367 = vst.msk [vmem:[#allocation2 + $0xf9] sm:$0xff] %vm227_vm0, %v2199_v24  ;;  %2281 = vmatprep.subr.bf16.mxu0 %v2377_v11  ;;  %2328 = vmatprep.subr.bf16.mxu1 %v2377_v11 }
  0x27   : > { %352 = vst.msk [vmem:[#allocation2 + $0x49] sm:$0xff] %vm227_vm0, %v2170_v25  ;;  %353 = vst.msk [vmem:[#allocation2 + $0x51] sm:$0xff] %vm227_vm0, %v2171_v26  ;;  %v2186_v25 = vunpack.c.l.bf16 %v2229_v23  ;;  %v2187_v26 = vunpack.c.h.bf16 %v2229_v23 }
  0x28   : > { %368 = vst.msk [vmem:[#allocation2 + $0x109] sm:$0xff] %vm227_vm0, %v2202_v27  ;;  %369 = vst.msk [vmem:[#allocation2 + $0x111] sm:$0xff] %vm227_vm0, %v2203_v30  ;;  %v2379_v27 = vld [vmem:[%s3232_s1 + $0x18] sm:$0xff]  }
  0x29   : > { %354 = vst.msk [vmem:[#allocation2 + $0x61] sm:$0xff] %vm227_vm0, %v2174_v31  ;;  %355 = vst.msk [vmem:[#allocation2 + $0x69] sm:$0xff] %vm227_vm0, %v2175_v32  ;;  %v444_v40 = vld [vmem:[#allocation2 + $0xc1] sm:$0xff]  ;;  %v445_v41 = vld [vmem:[#allocation2 + $0xc9] sm:$0xff]  ;;  %2282 = vmatpush3.bf16.msra.mxu0 %v2377_v11  ;;  %2336 = vmatpush3.bf16.msra.mxu1 %v2377_v11 }
  0x2a   : > { %370 = vst.msk [vmem:[#allocation2 + $0x121] sm:$0xff] %vm227_vm0, %v2206_v33  ;;  %371 = vst.msk [vmem:[#allocation2 + $0x129] sm:$0xff] %vm227_vm0, %v2207_v35  ;;  %v430_v42 = vld [vmem:[#allocation2 + $0x19] sm:$0xff]  ;;  %v468_v43 = vpack.c.bf16 %v445_v41, %v444_v40  ;;  %v431_v44 = vld [vmem:[#allocation2 + $0x21] sm:$0xff]  ;;  %2283 = vmatprep.subr.bf16.mxu0 %v2378_v21  ;;  %2329 = vmatprep.subr.bf16.mxu1 %v2378_v21 }
  0x2b   : > { %356 = vst.msk [vmem:[#allocation2 + $0x79] sm:$0xff] %vm227_vm0, %v2178_v36  ;;  %357 = vst.msk [vmem:[#allocation2 + $0x81] sm:$0xff] %vm227_vm0, %v2179_v37  ;;  %v478_v45 = vld [vmem:[#allocation2 + $0x1a] sm:$0xff]  ;;  %v479_v46 = vld [vmem:[#allocation2 + $0x22] sm:$0xff]  ;;  %v461_v47 = vpack.c.bf16 %v431_v44, %v430_v42  ;;  %v2218_v36 = vunpack.c.l.bf16 %v2237_v34  ;;  %v2219_v37 = vunpack.c.h.bf16 %v2237_v34 }
  0x2c   : > { %372 = vst.msk [vmem:[#allocation2 + $0x139] sm:$0xff] %vm227_vm0, %v2210_v38  ;;  %373 = vst.msk [vmem:[#allocation2 + $0x141] sm:$0xff] %vm227_vm0, %v2211_v39  ;;  %v446_v48 = vld [vmem:[#allocation2 + $0xd9] sm:$0xff]  ;;  %v447_v49 = vld [vmem:[#allocation2 + $0xe1] sm:$0xff]  ;;  %845 = vrot.lane.b32.xlu0 %v468_v43, %s2409_s20  ;;  %v509_v50 = vpack.c.bf16 %v479_v46, %v478_v45 }
  0x2d   : > { %831 = vrot.lane.b32.xlu1 %v461_v47, %s2409_s20  ;;  %v469_v51 = vpack.c.bf16 %v447_v49, %v446_v48  ;;  %v524_v52 = vld [vmem:[#allocation2 + $0x18] sm:$0xff]  ;;  %v525_v53 = vld [vmem:[#allocation2 + $0x20] sm:$0xff]  ;;  %v493_v55 = vld [vmem:[#allocation2 + $0xca] sm:$0xff]  ;;  %358 = vst.msk [vmem:[#allocation2 + $0x91] sm:$0xff] %vm227_vm0, %v2182_v12  ;;  %2284 = vmatpush3.bf16.msra.mxu0 %v2378_v21 }
  0x2e   : > { %v492_v54 = vld [vmem:[#allocation2 + $0xc2] sm:$0xff]  ;;  %v2561_v56 = vpack.c.bf16 %v525_v53, %v524_v52  ;;  %v526_v58 = vld [vmem:[#allocation2 + $0x30] sm:$0xff]  ;;  %v527_v59 = vld [vmem:[#allocation2 + $0x38] sm:$0xff]  ;;  %359 = vst.msk [vmem:[#allocation2 + $0x99] sm:$0xff] %vm227_vm0, %v2183_v13  ;;  %2285 = vmatprep.subr.bf16.mxu0 %v2379_v27  ;;  %2337 = vmatpush3.bf16.msra.mxu1 %v2378_v21 }
  0x2f   : > { %v516_v57 = vpack.c.bf16 %v493_v55, %v492_v54  ;;  %v494_v60 = vld [vmem:[#allocation2 + $0xda] sm:$0xff]  ;;  %v495_v61 = vld [vmem:[#allocation2 + $0xe2] sm:$0xff]  ;;  %v2566_v62 = vpack.c.bf16 %v527_v59, %v526_v58  ;;  %v574_v3 = vld [vmem:[#allocation2 + $0x31] sm:$0xff]  ;;  %374 = vst.msk [vmem:[#allocation2 + $0x151] sm:$0xff] %vm227_vm0, %v2214_v17  ;;  %2330 = vmatprep.subr.bf16.mxu1 %v2379_v27 }
  0x30   : > { %879 = vrot.lane.b32.xlu0 %v509_v50, %s2410_s21  ;;  %v2569_v63 = vpack.c.bf16 %v495_v61, %v494_v60  ;;  %v540_v0 = vld [vmem:[#allocation2 + $0xd8] sm:$0xff]  ;;  %v541_v1 = vld [vmem:[#allocation2 + $0xe0] sm:$0xff]  ;;  %v542_v5 = vld [vmem:[#allocation2 + $0xf0] sm:$0xff]  ;;  %375 = vst.msk [vmem:[#allocation2 + $0x159] sm:$0xff] %vm227_vm0, %v2215_v18 }
  0x31   : > { %847 = vrot.lane.b32.xlu1 %v469_v51, %s2409_s20  ;;  %v2575_v2 = vpack.c.bf16 %v541_v1, %v540_v0  ;;  %v575_v4 = vld [vmem:[#allocation2 + $0x39] sm:$0xff]  ;;  %v590_v19 = vld [vmem:[#allocation2 + $0xf1] sm:$0xff]  ;;  %360 = vst.msk [vmem:[#allocation2 + $0xa9] sm:$0xff] %vm227_vm0, %v2186_v25  ;;  %361 = vst.msk [vmem:[#allocation2 + $0xb1] sm:$0xff] %vm227_vm0, %v2187_v26  ;;  %2286 = vmatpush3.bf16.msra.mxu0 %v2379_v27 }
  0x32   : > { %v543_v6 = vld [vmem:[#allocation2 + $0xf8] sm:$0xff]  ;;  %v2578_v7 = vpack.c.bf16 %v575_v4, %v574_v3  ;;  %v671_v28 = vld [vmem:[#allocation2 + $0x48] sm:$0xff]  ;;  %v672_v29 = vld [vmem:[#allocation2 + $0x50] sm:$0xff]  ;;  %2338 = vmatpush3.bf16.msra.mxu1 %v2379_v27  ;;  %376 = vst.msk [vmem:[#allocation2 + $0x169] sm:$0xff] %vm227_vm0, %v2218_v36 }
  0x33   : > { %v2582_v8 = vpack.c.bf16 %v543_v6, %v542_v5  ;;  %v622_v15 = vld [vmem:[#allocation2 + $0x32] sm:$0xff]  ;;  %v623_v16 = vld [vmem:[#allocation2 + $0x3a] sm:$0xff]  ;;  %v2624_v33 = vpack.c.bf16 %v672_v29, %v671_v28  ;;  %v2381_v38 = vld [vmem:[%s3232_s1 + $0x28] sm:$0xff]   ;;  %377 = vst.msk [vmem:[#allocation2 + $0x171] sm:$0xff] %vm227_vm0, %v2219_v37 }
  0x34   : > { %925 = vrot.lane.b32.xlu0 %v2561_v56, %s2411_s22  ;;  %v591_v20 = vld [vmem:[#allocation2 + $0xf9] sm:$0xff]  ;;  %v2604_v22 = vpack.c.bf16 %v623_v16, %v622_v15  ;;  %v719_v39 = vld [vmem:[#allocation2 + $0x49] sm:$0xff]  ;;  %v720_v40 = vld [vmem:[#allocation2 + $0x51] sm:$0xff] }
  0x35   : > { %893 = vrot.lane.b32.xlu1 %v516_v57, %s2410_s21  ;;  %v2608_v24 = vpack.c.bf16 %v591_v20, %v590_v19  ;;  %v638_v30 = vld [vmem:[#allocation2 + $0xf2] sm:$0xff]  ;;  %v639_v31 = vld [vmem:[#allocation2 + $0xfa] sm:$0xff]  ;;  %v687_v41 = vld [vmem:[#allocation2 + $0x108] sm:$0xff]  ;;  %v750_v44 = vpack.c.bf16 %v720_v40, %v719_v39 }
  0x36   : > { %v2380_v32 = vld [vmem:[%s3232_s1 + $0x20] sm:$0xff]   ;;  %v2629_v35 = vpack.c.bf16 %v639_v31, %v638_v30  ;;  %v688_v42 = vld [vmem:[#allocation2 + $0x110] sm:$0xff]  ;;  %v2383_v46 = vld [vmem:[%s3232_s1 + $0x38] sm:$0xff]  }
  0x37   : > { %2287 = vmatprep.subr.bf16.mxu0 %v2380_v32  ;;  %2331 = vmatprep.subr.bf16.mxu1 %v2380_v32  ;;  %v2382_v43 = vld [vmem:[%s3232_s1 + $0x30] sm:$0xff]   ;;  %v2647_v45 = vpack.c.bf16 %v688_v42, %v687_v41  ;;  %v530_v57 = vld [vmem:[#allocation2 + $0x60] sm:$0xff]  ;;  %v531_v58 = vld [vmem:[#allocation2 + $0x68] sm:$0xff] }
  0x38   : > { %927 = vrot.lane.b32.xlu0 %v2566_v62, %s2411_s22  ;;  %2288 = vmatpush3.bf16.msra.mxu0 %v2380_v32  ;;  %v736_v48 = vld [vmem:[#allocation2 + $0x111] sm:$0xff]  ;;  %v559_v59 = vpack.c.bf16 %v531_v58, %v530_v57  ;;  %v578_v0 = vld [vmem:[#allocation2 + $0x61] sm:$0xff]  ;;  %v579_v1 = vld [vmem:[#allocation2 + $0x69] sm:$0xff] }
  0x39   : > { %895 = vrot.lane.b32.xlu1 %v2569_v63, %s2410_s21  ;;  %2289 = vmatprep.subr.bf16.mxu0 %v2381_v38  ;;  %v783_v53 = vld [vmem:[#allocation2 + $0x10a] sm:$0xff]  ;;  %v784_v54 = vld [vmem:[#allocation2 + $0x112] sm:$0xff]  ;;  %v546_v3 = vld [vmem:[#allocation2 + $0x120] sm:$0xff]  ;;  %v607_v5 = vpack.c.bf16 %v579_v1, %v578_v0 }
  0x3a   : > { %2339 = vmatpush3.bf16.msra.mxu1 %v2380_v32  ;;  %v806_v55 = vpack.c.bf16 %v784_v54, %v783_v53  ;;  %v2238_v60 = vld [vmem:[%s2521_s19 + $0x78] sm:$0xff]   ;;  %v547_v4 = vld [vmem:[#allocation2 + $0x128] sm:$0xff]  ;;  %v676_v15 = vld [vmem:[#allocation2 + $0x80] sm:$0xff] }
  0x3b   : > { %2332 = vmatprep.subr.bf16.mxu1 %v2381_v38  ;;  %v2222_v61 = vunpack.c.l.bf16 %v2238_v60  ;;  %v567_v6 = vpack.c.bf16 %v547_v4, %v546_v3  ;;  %v627_v9 = vld [vmem:[#allocation2 + $0x6a] sm:$0xff]  ;;  %v594_v10 = vld [vmem:[#allocation2 + $0x121] sm:$0xff]  ;;  %v675_v14 = vld [vmem:[#allocation2 + $0x78] sm:$0xff] }
  0x3c   : > { %973 = vrot.lane.b32.xlu0 %v461_v47, %s2412_s23  ;;  %2290 = vmatpush3.bf16.msra.mxu0 %v2381_v38  ;;  %v735_v47 = vld [vmem:[#allocation2 + $0x109] sm:$0xff]  ;;  %v704_v18 = vpack.c.bf16 %v676_v15, %v675_v14  ;;  %v723_v20 = vld [vmem:[#allocation2 + $0x79] sm:$0xff]  ;;  %v724_v21 = vld [vmem:[#allocation2 + $0x81] sm:$0xff] }
  0x3d   : > { %941 = vrot.lane.b32.xlu1 %v2575_v2, %s2411_s22  ;;  %2291 = vmatprep.subr.bf16.mxu0 %v2382_v43  ;;  %v758_v49 = vpack.c.bf16 %v736_v48, %v735_v47  ;;  %378 = vst.msk [vmem:[#allocation2 + $0x181] sm:$0xff] %vm227_vm0, %v2222_v61  ;;  %v595_v11 = vld [vmem:[#allocation2 + $0x129] sm:$0xff]  ;;  %v692_v23 = vld [vmem:[#allocation2 + $0x140] sm:$0xff]  ;;  %v582_v57 = vld [vmem:[#allocation2 + $0x91] sm:$0xff] }
  0x3e   : > { %2340 = vmatpush3.bf16.msra.mxu1 %v2381_v38  ;;  %v615_v13 = vpack.c.bf16 %v595_v11, %v594_v10  ;;  %v642_v16 = vld [vmem:[#allocation2 + $0x122] sm:$0xff]  ;;  %v643_v17 = vld [vmem:[#allocation2 + $0x12a] sm:$0xff]  ;;  %v739_v28 = vld [vmem:[#allocation2 + $0x139] sm:$0xff] }
  0x3f   : > { %2333 = vmatprep.subr.bf16.mxu1 %v2382_v43  ;;  %v663_v19 = vpack.c.bf16 %v643_v17, %v642_v16  ;;  %v740_v29 = vld [vmem:[#allocation2 + $0x141] sm:$0xff]  ;;  %v583_v58 = vld [vmem:[#allocation2 + $0x99] sm:$0xff] }
  0x40   : > { %975 = vrot.lane.b32.xlu0 %v2578_v7, %s2412_s23  ;;  %2292 = vmatpush3.bf16.msra.mxu0 %v2382_v43  ;;  %v2705_v30 = vpack.c.bf16 %v740_v29, %v739_v28  ;;  %v771_v31 = vld [vmem:[#allocation2 + $0x7a] sm:$0xff]  ;;  %v772_v32 = vld [vmem:[#allocation2 + $0x82] sm:$0xff]  ;;  %v2761_v0 = vpack.c.bf16 %v583_v58, %v582_v57  ;;  %v646_v28 = vld [vmem:[#allocation2 + $0x152] sm:$0xff] }
  0x41   : > { %943 = vrot.lane.b32.xlu1 %v2582_v8, %s2411_s22  ;;  %2293 = vmatprep.subr.bf16.mxu0 %v2383_v46  ;;  %v800_v36 = vpack.c.bf16 %v772_v32, %v771_v31  ;;  %v787_v40 = vld [vmem:[#allocation2 + $0x13a] sm:$0xff]  ;;  %v788_v41 = vld [vmem:[#allocation2 + $0x142] sm:$0xff] }
  0x42   : > { %2341 = vmatpush3.bf16.msra.mxu1 %v2382_v43  ;;  %v2726_v43 = vpack.c.bf16 %v788_v41, %v787_v40  ;;  %v551_v61 = vld [vmem:[#allocation2 + $0x158] sm:$0xff]  ;;  %v381_v4 = vld [vmem:[#allocation2 + $0x8] sm:$0xff] }
  0x43   : > { %2334 = vmatprep.subr.bf16.mxu1 %v2383_v46  ;;  %v647_v29 = vld [vmem:[#allocation2 + $0x15a] sm:$0xff]  ;;  %v727_v58 = vld [vmem:[#allocation2 + $0xa9] sm:$0xff] }
  0x44   : > { %1021 = vrot.lane.b32.xlu0 %v509_v50, %s2413_s30  ;;  %v767_v50 = vld [vmem:[#allocation2 + $0x4a] sm:$0xff]  ;;  %2294 = vmatpush3.bf16.msra.mxu0 %v2383_v46  ;;  %v2807_v40 = vpack.c.bf16 %v647_v29, %v646_v28 }
  0x45   : > { %989 = vrot.lane.b32.xlu1 %v469_v51, %s2412_s23  ;;  %v768_v51 = vld [vmem:[#allocation2 + $0x52] sm:$0xff] }
  0x46   : > { %2342 = vmatpush3.bf16.msra.mxu1 %v2383_v46  ;;  %v798_v52 = vpack.c.bf16 %v768_v51, %v767_v50  ;;  %v535_v50 = vld [vmem:[#allocation2 + $0x98] sm:$0xff] }
  0x48   : > { %1023 = vrot.lane.b32.xlu0 %v2604_v22, %s2413_s30 }
  0x49   : > { %991 = vrot.lane.b32.xlu1 %v2608_v24, %s2412_s23 }
  0x4c   : > { %1069 = vrot.lane.b32.xlu0 %v2566_v62, %s2414_s8 }
  0x4d   : > { %1037 = vrot.lane.b32.xlu1 %v2569_v63, %s2413_s30  ;;  %v2223_v63 = vunpack.c.h.bf16 %v2238_v60  ;;  %v550_v60 = vld [vmem:[#allocation2 + $0x150] sm:$0xff] }
  0x4e   : > { %v2764_v1 = vpack.c.bf16 %v551_v61, %v550_v60 }
  0x4f   : > { %379 = vst.msk [vmem:[#allocation2 + $0x189] sm:$0xff] %vm227_vm0, %v2223_v63 }
  0x50   : > { %1071 = vrot.lane.b32.xlu0 %v2624_v33, %s2414_s8 }
  0x51   : > { %1039 = vrot.lane.b32.xlu1 %v2629_v35, %s2413_s30 }
  0x54   : > { %1117 = vrot.lane.b32.xlu0 %v2578_v7, %s2415_s18 }
  0x55   : > { %1085 = vrot.lane.b32.xlu1 %v2582_v8, %s2414_s8 }
  0x58   : > { %1119 = vrot.lane.b32.xlu0 %v750_v44, %s2415_s18 }
  0x59   : > { %1087 = vrot.lane.b32.xlu1 %v2647_v45, %s2414_s8 }
  0x5c   : > { %1165 = vrot.lane.b32.xlu0 %v2604_v22, %s2416_s26 }
  0x5d   : > { %1133 = vrot.lane.b32.xlu1 %v2608_v24, %s2415_s18 }
  0x60   : > { %833 = vrot.lane.b32.xlu0 %v2578_v7, %s2409_s20  ;;  %v626_v7 = vld [vmem:[#allocation2 + $0x62] sm:$0xff] }
  0x61   : > { %1135 = vrot.lane.b32.xlu1 %v758_v49, %s2415_s18  ;;  %v655_v12 = vpack.c.bf16 %v627_v9, %v626_v7  ;;  %v630_v7 = vld [vmem:[#allocation2 + $0x92] sm:$0xff]  ;;  %v631_v9 = vld [vmem:[#allocation2 + $0x9a] sm:$0xff] }
  0x62   : > { %v2777_v15 = vpack.c.bf16 %v631_v9, %v630_v7 }
  0x64   : > { %1167 = vrot.lane.b32.xlu0 %v798_v52, %s2416_s26 }
  0x65   : > { %1181 = vrot.lane.b32.xlu1 %v2629_v35, %s2416_s26 }
  0x68   : > { %835 = vrot.lane.b32.xlu0 %v750_v44, %s2409_s20 }
  0x69   : > { %849 = vrot.lane.b32.xlu1 %v2608_v24, %s2409_s20  ;;  %v752_v24 = vpack.c.bf16 %v724_v21, %v723_v20  ;;  %v396_v20 = vld [vmem:[#allocation2 + $0xc0] sm:$0xff]  ;;  %v397_v21 = vld [vmem:[#allocation2 + $0xc8] sm:$0xff] }
  0x6c   : > { %881 = vrot.lane.b32.xlu0 %v2604_v22, %s2410_s21  ;;  %v691_v22 = vld [vmem:[#allocation2 + $0x138] sm:$0xff] }
  0x6d   : > { %1183 = vrot.lane.b32.xlu1 %v806_v55, %s2416_s26  ;;  %v712_v26 = vpack.c.bf16 %v692_v23, %v691_v22  ;;  %v679_v23 = vld [vmem:[#allocation2 + $0xa8] sm:$0xff] }
  0x70   : > { %883 = vrot.lane.b32.xlu0 %v798_v52, %s2410_s21 }
  0x71   : > { %851 = vrot.lane.b32.xlu1 %v758_v49, %s2409_s20 }
  0x74   : > { %929 = vrot.lane.b32.xlu0 %v2624_v33, %s2411_s22 }
  0x75   : > { %897 = vrot.lane.b32.xlu1 %v2629_v35, %s2410_s21 }
  0x78   : > { %931 = vrot.lane.b32.xlu0 %v559_v59, %s2411_s22 }
  0x79   : > { %899 = vrot.lane.b32.xlu1 %v806_v55, %s2410_s21 }
  0x7c   : > { %977 = vrot.lane.b32.xlu0 %v750_v44, %s2412_s23 }
  0x7d   : > { %945 = vrot.lane.b32.xlu1 %v2647_v45, %s2411_s22 }
  0x80   : > { %979 = vrot.lane.b32.xlu0 %v607_v5, %s2412_s23 }
  0x81   : > { %947 = vrot.lane.b32.xlu1 %v567_v6, %s2411_s22 }
  0x84   : > { %1025 = vrot.lane.b32.xlu0 %v798_v52, %s2413_s30  ;;  %v2697_v25 = vpop.permute.xlu0 %829 }
  0x85   : > { %993 = vrot.lane.b32.xlu1 %v758_v49, %s2412_s23  ;;  %v534_v49 = vld [vmem:[#allocation2 + $0x90] sm:$0xff] }
  0x86   : > { %v2747_v53 = vpack.c.bf16 %v535_v50, %v534_v49 }
  0x88   : > { %1027 = vrot.lane.b32.xlu0 %v655_v12, %s2413_s30  ;;  %v2701_v27 = vpop.permute.xlu0 %877 }
  0x89   : > { %995 = vrot.lane.b32.xlu1 %v615_v13, %s2412_s23 }
  0x8c   : > { %1073 = vrot.lane.b32.xlu0 %v559_v59, %s2414_s8 }
  0x8d   : > { %1041 = vrot.lane.b32.xlu1 %v806_v55, %s2413_s30 }
  0x90   : > { %1075 = vrot.lane.b32.xlu0 %v704_v18, %s2414_s8 }
  0x91   : > { %1043 = vrot.lane.b32.xlu1 %v663_v19, %s2413_s30 }
  0x94   : > { %1121 = vrot.lane.b32.xlu0 %v607_v5, %s2415_s18 }
  0x95   : > { %1089 = vrot.lane.b32.xlu1 %v567_v6, %s2414_s8 }
  0x98   : > { %1123 = vrot.lane.b32.xlu0 %v752_v24, %s2415_s18 }
  0x99   : > { %1091 = vrot.lane.b32.xlu1 %v712_v26, %s2414_s8 }
  0x9c   : > { %1169 = vrot.lane.b32.xlu0 %v655_v12, %s2416_s26 }
  0x9d   : > { %1137 = vrot.lane.b32.xlu1 %v615_v13, %s2415_s18 }
  0x9e   : > { %v2707_v34 = vpop.permute.xlu0 %845 }
  0x9f   : > { %v2709_v35 = vpop.permute.xlu1 %831 }
  0xa0   : > { %837 = vrot.lane.b32.xlu0 %v607_v5, %s2409_s20  ;;  %v380_v5 = vld [vmem:[#allocation2] sm:$0xff]  ;;  %v1202_v57 = vsel %vm227_vm0, %v2561_v56, %v2709_v35  ;;  %v695_v35 = vld [vmem:[#allocation2 + $0x168] sm:$0xff] }
  0xa1   : > { %1139 = vrot.lane.b32.xlu1 %v2705_v30, %s2415_s18  ;;  %v412_v10 = vpack.c.bf16 %v381_v4, %v380_v5 }
  0xa2   : > { %v2714_v37 = vpop.permute.xlu0 %879 }
  0xa3   : > { %v2716_v38 = vpop.permute.xlu1 %847  ;;  %v1199_v17 = vsel %vm227_vm0, %v412_v10, %v2697_v25 }
  0xa4   : > { %1171 = vrot.lane.b32.xlu0 %v800_v36, %s2416_s26  ;;  %v1247_v22 = vsel %vm1245_vm2, %v1199_v17, %v2701_v27 }
  0xa5   : > { %1185 = vrot.lane.b32.xlu1 %v663_v19, %s2416_s26 }
  0xa6   : > { %v2720_v39 = vpop.permute.xlu0 %925 }
  0xa7   : > { %v2722_v42 = vpop.permute.xlu1 %893  ;;  %v1280_v25 = vsel %vm1278_vm3, %v1247_v22, %v2720_v39 }
  0xa8   : > { %839 = vrot.lane.b32.xlu0 %v752_v24, %s2409_s20 }
  0xa9   : > { %853 = vrot.lane.b32.xlu1 %v615_v13, %s2409_s20  ;;  %v599_v13 = vld [vmem:[#allocation2 + $0x159] sm:$0xff] }
  0xaa   : > { %v2728_v44 = vpop.permute.xlu0 %927 }
  0xab   : > { %v2730_v46 = vpop.permute.xlu1 %895 }
  0xac   : > { %885 = vrot.lane.b32.xlu0 %v655_v12, %s2410_s21  ;;  %v598_v12 = vld [vmem:[#allocation2 + $0x151] sm:$0xff] }
  0xad   : > { %1187 = vrot.lane.b32.xlu1 %v2726_v43, %s2416_s26  ;;  %v2781_v16 = vpack.c.bf16 %v599_v13, %v598_v12 }
  0xae   : > { %v2735_v47 = vpop.permute.xlu0 %973 }
  0xaf   : > { %v2737_v48 = vpop.permute.xlu1 %941  ;;  %v1313_v31 = vsel %vm1311_vm4, %v1280_v25, %v2735_v47  ;;  %v776_v25 = vld [vmem:[#allocation2 + $0xb2] sm:$0xff] }
  0xb0   : > { %887 = vrot.lane.b32.xlu0 %v800_v36, %s2410_s21 }
  0xb1   : > { %855 = vrot.lane.b32.xlu1 %v2705_v30, %s2409_s20 }
  0xb2   : > { %v2742_v51 = vpop.permute.xlu0 %975 }
  0xb3   : > { %v2744_v52 = vpop.permute.xlu1 %943 }
  0xb4   : > { %933 = vrot.lane.b32.xlu0 %v704_v18, %s2411_s22 }
  0xb5   : > { %901 = vrot.lane.b32.xlu1 %v663_v19, %s2410_s21 }
  0xb6   : > { %v1022_v54 = vpop.permute.xlu0 %1021 }
  0xb7   : > { %v2750_v55 = vpop.permute.xlu1 %989  ;;  %v1346_v32 = vsel %vm1344_vm5, %v1313_v31, %v1022_v54 }
  0xb8   : > { %935 = vrot.lane.b32.xlu0 %v2747_v53, %s2411_s22 }
  0xb9   : > { %903 = vrot.lane.b32.xlu1 %v2726_v43, %s2410_s21 }
  0xba   : > { %v2756_v59 = vpop.permute.xlu0 %1023 }
  0xbb   : > { %v2758_v63 = vpop.permute.xlu1 %991 }
  0xbc   : > { %981 = vrot.lane.b32.xlu0 %v752_v24, %s2412_s23  ;;  %v680_v24 = vld [vmem:[#allocation2 + $0xb0] sm:$0xff] }
  0xbd   : > { %949 = vrot.lane.b32.xlu1 %v712_v26, %s2411_s22 }
  0xbe   : > { %v1070_v3 = vpop.permute.xlu0 %1069 }
  0xbf   : > { %v2766_v6 = vpop.permute.xlu1 %1037  ;;  %v1379_v39 = vsel %vm1377_vm6, %v1346_v32, %v1070_v3  ;;  %v696_v3 = vld [vmem:[#allocation2 + $0x170] sm:$0xff] }
  0xc0   : > { %983 = vrot.lane.b32.xlu0 %v2761_v0, %s2412_s23 }
  0xc1   : > { %951 = vrot.lane.b32.xlu1 %v2764_v1, %s2411_s22 }
  0xc2   : > { %v2772_v11 = vpop.permute.xlu0 %1071 }
  0xc3   : > { %v2774_v14 = vpop.permute.xlu1 %1039 }
  0xc4   : > { %1029 = vrot.lane.b32.xlu0 %v800_v36, %s2413_s30  ;;  %v2802_v36 = vpack.c.bf16 %v680_v24, %v679_v23  ;;  %v775_v24 = vld [vmem:[#allocation2 + $0xaa] sm:$0xff] }
  0xc5   : > { %997 = vrot.lane.b32.xlu1 %v2705_v30, %s2412_s23  ;;  %v2793_v30 = vpack.c.bf16 %v397_v21, %v396_v20  ;;  %v743_v20 = vld [vmem:[#allocation2 + $0x169] sm:$0xff]  ;;  %v744_v21 = vld [vmem:[#allocation2 + $0x171] sm:$0xff] }
  0xc6   : > { %v1118_v18 = vpop.permute.xlu0 %1117 }
  0xc7   : > { %v1086_v19 = vpop.permute.xlu1 %1085  ;;  %v1412_v41 = vsel %vm1410_vm7, %v1379_v39, %v1118_v18  ;;  %v1223_v49 = vsel %vm227_vm0, %v2793_v30, %v2707_v34  ;;  %v728_v34 = vld [vmem:[#allocation2 + $0xb1] sm:$0xff] }
  0xc8   : > { %1031 = vrot.lane.b32.xlu0 %v2777_v15, %s2413_s30  ;;  %v1263_v60 = vsel %vm1245_vm2, %v1223_v49, %v2722_v42  ;;  %v791_v39 = vld [vmem:[#allocation2 + $0x16a] sm:$0xff] }
  0xc9   : > { %999 = vrot.lane.b32.xlu1 %v2781_v16, %s2412_s23  ;;  %v1296_v4 = vsel %vm1278_vm3, %v1263_v60, %v2737_v48  ;;  %v587_v60 = vld [vmem:[#allocation2 + $0xc9] sm:$0xff] }
  0xca   : > { %v1120_v26 = vpop.permute.xlu0 %1119  ;;  %v1329_v7 = vsel %vm1311_vm4, %v1296_v4, %v2750_v55 }
  0xcb   : > { %v2797_v27 = vpop.permute.xlu1 %1087  ;;  %v1362_v9 = vsel %vm1344_vm5, %v1329_v7, %v2766_v6 }
  0xcc   : > { %1077 = vrot.lane.b32.xlu0 %v2747_v53, %s2414_s8  ;;  %v1395_v55 = vsel %vm1377_vm6, %v1362_v9, %v1086_v19  ;;  %v635_v9 = vld [vmem:[#allocation2 + $0xca] sm:$0xff] }
  0xcd   : > { %1045 = vrot.lane.b32.xlu1 %v2726_v43, %s2413_s30  ;;  %v1249_v43 = vsel %vm1245_vm2, %v1202_v57, %v2714_v37 }
  0xce   : > { %v1166_v47 = vpop.permute.xlu0 %1165  ;;  %v1282_v61 = vsel %vm1278_vm3, %v1249_v43, %v2728_v44  ;;  %v2840_v44 = vpack.c.bf16 %v728_v34, %v727_v58  ;;  %v586_v34 = vld [vmem:[#allocation2 + $0xc1] sm:$0xff] }
  0xcf   : > { %v1134_v50 = vpop.permute.xlu1 %1133  ;;  %v1445_v54 = vsel %vm1443_vm8, %v1412_v41, %v1166_v47  ;;  %v1315_v37 = vsel %vm1311_vm4, %v1282_v61, %v2742_v51  ;;  %v2848_v51 = vpack.c.bf16 %v696_v3, %v695_v35  ;;  %v792_v41 = vld [vmem:[#allocation2 + $0x172] sm:$0xff]  ;;  %v554_v35 = vld [vmem:[#allocation2 + $0x180] sm:$0xff]  ;;  %v555_v3 = vld [vmem:[#allocation2 + $0x188] sm:$0xff] }
  0xd0   : > { %1079 = vrot.lane.b32.xlu0 %v2802_v36, %s2414_s8  ;;  %2295 = vmatprep.mubr.msk.bf16.mxu0 %vm1476_vm9, %v1445_v54  ;;  %v1348_v42 = vsel %vm1344_vm5, %v1315_v37, %v2756_v59  ;;  %v1428_v12 = vsel %vm1410_vm7, %v1395_v55, %v1134_v50  ;;  %v571_v37 = vpack.c.bf16 %v555_v3, %v554_v35  ;;  %v602_v55 = vld [vmem:[#allocation2 + $0x181] sm:$0xff] }
  0xd1   : > { %1047 = vrot.lane.b32.xlu1 %v2807_v40, %s2413_s30  ;;  %v1381_v48 = vsel %vm1377_vm6, %v1348_v42, %v2772_v11  ;;  %v1226_v11 = vsel %vm227_vm0, %v2575_v2, %v2716_v38  ;;  %v634_v42 = vld [vmem:[#allocation2 + $0xc2] sm:$0xff] }
  0xd2   : > { %v2828_v56 = vpop.permute.xlu0 %833  ;;  %v1414_v59 = vsel %vm1410_vm7, %v1381_v48, %v1120_v26  ;;  %v1265_v18 = vsel %vm1245_vm2, %v1226_v11, %v2730_v46  ;;  %v762_v46 = vpack.c.bf16 %v744_v21, %v743_v20  ;;  %v684_v20 = vld [vmem:[#allocation2 + $0xe0] sm:$0xff] }
  0xd3   : > { %v1136_v5 = vpop.permute.xlu1 %1135  ;;  %v1298_v22 = vsel %vm1278_vm3, %v1265_v18, %v2744_v52  ;;  %v683_v18 = vld [vmem:[#allocation2 + $0xd8] sm:$0xff] }
  0xd4   : > { %1125 = vrot.lane.b32.xlu0 %v2761_v0, %s2415_s18  ;;  %v1331_v2 = vsel %vm1311_vm4, %v1298_v22, %v2758_v63 }
  0xd5   : > { %1093 = vrot.lane.b32.xlu1 %v2764_v1, %s2414_s8  ;;  %v1364_v38 = vsel %vm1344_vm5, %v1331_v2, %v2774_v14  ;;  %v802_v14 = vpack.c.bf16 %v776_v25, %v775_v24  ;;  %v650_v2 = vld [vmem:[#allocation2 + $0x182] sm:$0xff] }
  0xd6   : > { %v1168_v10 = vpop.permute.xlu0 %1167  ;;  %v1397_v52 = vsel %vm1377_vm6, %v1364_v38, %v2797_v27  ;;  %v651_v38 = vld [vmem:[#allocation2 + $0x18a] sm:$0xff] }
  0xd7   : > { %v1447_v13 = vsel %vm1443_vm8, %v1414_v59, %v1168_v10  ;;  %v1182_v17 = vpop.permute.xlu1 %1181  ;;  %v1430_v28 = vsel %vm1410_vm7, %v1397_v52, %v1136_v5  ;;  %v603_v59 = vld [vmem:[#allocation2 + $0x189] sm:$0xff]  ;;  %v2961_v52 = vpack.c.bf16 %v651_v38, %v650_v2 }
  0xd8   : > { %1127 = vrot.lane.b32.xlu0 %v2840_v44, %s2415_s18  ;;  %2296 = vmatmul.mubr.msk.bf16.vlgmr.msra.gmra.mrb[0].mxu0 %vm1476_vm9, %v1447_v13  ;;  %v1461_v6 = vsel %vm1443_vm8, %v1428_v12, %v1182_v17  ;;  %v2943_v12 = vpack.c.bf16 %v603_v59, %v602_v55  ;;  %v747_v59 = vld [vmem:[#allocation2 + $0x199] sm:$0xff] }
  0xd9   : > { %1095 = vrot.lane.b32.xlu1 %v2848_v51, %s2414_s8  ;;  %2311 = vmatprep.mubr.msk.bf16.mxu1 %vm1476_vm9, %v1461_v6  ;;  %v1205_v6 = vsel %vm227_vm0, %v2566_v62, %v2828_v56  ;;  %v708_v56 = vpack.c.bf16 %v684_v20, %v683_v18 }
  0xda   : > { %v2866_v19 = vpop.permute.xlu0 %835 }
  0xdb   : > { %v2870_v23 = vpop.permute.xlu1 %849 }
  0xdc   : > { %1173 = vrot.lane.b32.xlu0 %v2777_v15, %s2416_s26 }
  0xdd   : > { %1141 = vrot.lane.b32.xlu1 %v2781_v16, %s2415_s18 }
  0xde   : > { %v2882_v26 = vpop.permute.xlu0 %881 }
  0xdf   : > { %v1184_v63 = vpop.permute.xlu1 %1183  ;;  %v1251_v11 = vsel %vm1245_vm2, %v1205_v6, %v2882_v26  ;;  %v1208_v26 = vsel %vm227_vm0, %v2624_v33, %v2866_v19  ;;  %v731_v33 = vld [vmem:[#allocation2 + $0xd9] sm:$0xff]  ;;  %v732_v19 = vld [vmem:[#allocation2 + $0xe1] sm:$0xff] }
  0xe0   : > { %v1463_v29 = vsel %vm1443_vm8, %v1430_v28, %v1184_v63  ;;  %841 = vrot.lane.b32.xlu0 %v2761_v0, %s2409_s20  ;;  %v810_v0 = vpack.c.bf16 %v792_v41, %v791_v39 }
  0xe1   : > { %1143 = vrot.lane.b32.xlu1 %v762_v46, %s2415_s18  ;;  %2312 = vmatmul.mubr.msk.bf16.vlgmr.msra.gmra.mrb[0].mxu1 %vm1476_vm9, %v1463_v29 }
  0xe2   : > { %v2890_v31 = vpop.permute.xlu0 %883 }
  0xe3   : > { %v2892_v32 = vpop.permute.xlu1 %851 }
  0xe4   : > { %1175 = vrot.lane.b32.xlu0 %v802_v14, %s2416_s26 }
  0xe5   : > { %1189 = vrot.lane.b32.xlu1 %v2807_v40, %s2416_s26 }
  0xe6   : > { %v930_v27 = vpop.permute.xlu0 %929 }
  0xe7   : > { %v2897_v47 = vpop.permute.xlu1 %897  ;;  %v1284_v21 = vsel %vm1278_vm3, %v1251_v11, %v930_v27  ;;  %v1253_v27 = vsel %vm1245_vm2, %v1208_v26, %v2890_v31 }
  0xe8   : > { %843 = vrot.lane.b32.xlu0 %v2840_v44, %s2409_s20 }
  0xe9   : > { %857 = vrot.lane.b32.xlu1 %v2781_v16, %s2409_s20 }
  0xea   : > { %v2903_v49 = vpop.permute.xlu0 %931 }
  0xeb   : > { %v2905_v50 = vpop.permute.xlu1 %899  ;;  %v1286_v41 = vsel %vm1278_vm3, %v1253_v27, %v2903_v49  ;;  %v756_v49 = vpack.c.bf16 %v732_v19, %v731_v33  ;;  %v388_v19 = vld [vmem:[#allocation2 + $0x60] sm:$0xff] }
  0xec   : > { %889 = vrot.lane.b32.xlu0 %v2777_v15, %s2410_s21 }
  0xed   : > { %1191 = vrot.lane.b32.xlu1 %v810_v0, %s2416_s26 }
  0xee   : > { %v978_v54 = vpop.permute.xlu0 %977 }
  0xef   : > { %v2910_v57 = vpop.permute.xlu1 %945 }
  0xf0   : > { %891 = vrot.lane.b32.xlu0 %v802_v14, %s2410_s21 }
  0xf1   : > { %859 = vrot.lane.b32.xlu1 %v762_v46, %s2409_s20 }
  0xf2   : > { %v2914_v43 = vpop.permute.xlu0 %979 }
  0xf3   : > { %v2916_v16 = vpop.permute.xlu1 %947 }
  0xf4   : > { %937 = vrot.lane.b32.xlu0 %v2802_v36, %s2411_s22 }
  0xf5   : > { %905 = vrot.lane.b32.xlu1 %v2807_v40, %s2410_s21  ;;  %v611_v40 = vpack.c.bf16 %v587_v60, %v586_v34 }
  0xf6   : > { %v1026_v15 = vpop.permute.xlu0 %1025 }
  0xf7   : > { %v2922_v58 = vpop.permute.xlu1 %993 }
  0xf8   : > { %939 = vrot.lane.b32.xlu0 %v2793_v30, %s2411_s22 }
  0xf9   : > { %907 = vrot.lane.b32.xlu1 %v810_v0, %s2410_s21 }
  0xfa   : > { %v2927_v61 = vpop.permute.xlu0 %1027 }
  0xfb   : > { %v2929_v4 = vpop.permute.xlu1 %995 }
  0xfc   : > { %985 = vrot.lane.b32.xlu0 %v2840_v44, %s2412_s23  ;;  %v2940_v44 = vpack.c.bf16 %v635_v9, %v634_v42  ;;  %v780_v9 = vld [vmem:[#allocation2 + $0xe2] sm:$0xff] }
  0xfd   : > { %953 = vrot.lane.b32.xlu1 %v2848_v51, %s2411_s22 }
  0xfe   : > { %v1074_v5 = vpop.permute.xlu0 %1073 }
  0xff   : > { %v1042_v7 = vpop.permute.xlu1 %1041 }
 0x100   : > { %987 = vrot.lane.b32.xlu0 %v611_v40, %s2412_s23 }
 0x101   : > { %955 = vrot.lane.b32.xlu1 %v571_v37, %s2411_s22 }
 0x102   : > { %v1076_v48 = vpop.permute.xlu0 %1075 }
 0x103   : > { %v2937_v10 = vpop.permute.xlu1 %1043 }
 0x104   : > { %1033 = vrot.lane.b32.xlu0 %v802_v14, %s2413_s30 }
 0x105   : > { %1001 = vrot.lane.b32.xlu1 %v762_v46, %s2412_s23  ;;  %v1317_v46 = vsel %vm1311_vm4, %v1284_v21, %v978_v54  ;;  %v699_v54 = vld [vmem:[#allocation2 + $0x198] sm:$0xff] }
 0x106   : > { %v1122_v13 = vpop.permute.xlu0 %1121  ;;  %v1350_v62 = vsel %vm1344_vm5, %v1317_v46, %v1026_v15  ;;  %v700_v15 = vld [vmem:[#allocation2 + $0x1a0] sm:$0xff] }
 0x107   : > { %v1090_v17 = vpop.permute.xlu1 %1089  ;;  %v1383_v25 = vsel %vm1377_vm6, %v1350_v62, %v1074_v5 }
 0x108   : > { %1035 = vrot.lane.b32.xlu0 %v2940_v44, %s2413_s30  ;;  %v1416_v28 = vsel %vm1410_vm7, %v1383_v25, %v1122_v13  ;;  %v748_v13 = vld [vmem:[#allocation2 + $0x1a1] sm:$0xff] }
 0x109   : > { %1003 = vrot.lane.b32.xlu1 %v2943_v12, %s2412_s23  ;;  %s3127_s23 = scalar_lea.vmem %s3234_s3, %s2126_s16 }
 0x10a   : > { %v1124_v22 = vpop.permute.xlu0 %1123 }
 0x10b   : > { %v1092_v24 = vpop.permute.xlu1 %1091 }
 0x10c   : > { %1081 = vrot.lane.b32.xlu0 %v2793_v30, %s2414_s8  ;;  %v1229_v30 = vsel %vm227_vm0, %v2582_v8, %v2870_v23  ;;  %v1319_v23 = vsel %vm1311_vm4, %v1286_v41, %v2914_v43 }
 0x10d   : > { %1049 = vrot.lane.b32.xlu1 %v810_v0, %s2413_s30  ;;  %v1267_v39 = vsel %vm1245_vm2, %v1229_v30, %v2897_v47  ;;  %v1352_v47 = vsel %vm1344_vm5, %v1319_v23, %v2927_v61  ;;  %v391_v23 = vld [vmem:[#allocation2 + $0x80] sm:$0xff] }
 0x10e   : > { %v1170_v63 = vpop.permute.xlu0 %1169  ;;  %v1300_v8 = vsel %vm1278_vm3, %v1267_v39, %v2910_v57  ;;  %v1385_v35 = vsel %vm1377_vm6, %v1352_v47, %v1076_v48  ;;  %v716_v57 = vpack.c.bf16 %v700_v15, %v699_v54 }
 0x10f   : > { %v1449_v29 = vsel %vm1443_vm8, %v1416_v28, %v1170_v63  ;;  %v1138_v14 = vpop.permute.xlu1 %1137  ;;  %v1333_v34 = vsel %vm1311_vm4, %v1300_v8, %v2922_v58  ;;  %v1418_v43 = vsel %vm1410_vm7, %v1385_v35, %v1124_v22  ;;  %v390_v8 = vld [vmem:[#allocation2 + $0x78] sm:$0xff]  ;;  %v405_v35 = vld [vmem:[#allocation2 + $0x128] sm:$0xff] }
 0x110   : > { %1083 = vrot.lane.b32.xlu0 %v708_v56, %s2414_s8  ;;  %2299 = vmatprep.mubr.msk.bf16.mxu0 %vm1476_vm9, %v1449_v29  ;;  %v1366_v60 = vsel %vm1344_vm5, %v1333_v34, %v1042_v7  ;;  %v779_v7 = vld [vmem:[#allocation2 + $0xda] sm:$0xff] }
 0x111   : > { %1051 = vrot.lane.b32.xlu1 %v2961_v52, %s2413_s30  ;;  %v1399_v3 = vsel %vm1377_vm6, %v1366_v60, %v1090_v17  ;;  %v404_v60 = vld [vmem:[#allocation2 + $0x120] sm:$0xff] }
 0x112   : > { %v2981_v0 = vpop.permute.xlu0 %837  ;;  %v1432_v58 = vsel %vm1410_vm7, %v1399_v3, %v1138_v14 }
 0x113   : > { %v1140_v31 = vpop.permute.xlu1 %1139 }
 0x114   : > { %1129 = vrot.lane.b32.xlu0 %v611_v40, %s2415_s18 }
 0x115   : > { %1097 = vrot.lane.b32.xlu1 %v571_v37, %s2414_s8  ;;  %v1232_v37 = vsel %vm227_vm0, %v2647_v45, %v2892_v32  ;;  %v804_v32 = vpack.c.bf16 %v780_v9, %v779_v7 }
 0x116   : > { %v1172_v5 = vpop.permute.xlu0 %1171  ;;  %v1269_v48 = vsel %vm1245_vm2, %v1232_v37, %v2905_v50  ;;  %v764_v50 = vpack.c.bf16 %v748_v13, %v747_v59  ;;  %v406_v13 = vld [vmem:[#allocation2 + $0x138] sm:$0xff] }
 0x117   : > { %v1451_v42 = vsel %vm1443_vm8, %v1418_v43, %v1172_v5  ;;  %v1186_v61 = vpop.permute.xlu1 %1185  ;;  %v1302_v17 = vsel %vm1278_vm3, %v1269_v48, %v2916_v16 }
 0x118   : > { %v1465_v40 = vsel %vm1443_vm8, %v1432_v58, %v1186_v61  ;;  %1131 = vrot.lane.b32.xlu0 %v756_v49, %s2415_s18  ;;  %2300 = vmatmul.mubr.msk.bf16.gmra.mrb[4].mxu0 %vm1476_vm9, %v1451_v42  ;;  %v1335_v45 = vsel %vm1311_vm4, %v1302_v17, %v2929_v4  ;;  %v417_v49 = vpack.c.bf16 %v391_v23, %v390_v8  ;;  %v407_v17 = vld [vmem:[#allocation2 + $0x140] sm:$0xff] }
 0x119   : > { %1099 = vrot.lane.b32.xlu1 %v716_v57, %s2414_s8  ;;  %2315 = vmatprep.mubr.msk.bf16.mxu1 %vm1476_vm9, %v1465_v40  ;;  %v1368_v11 = vsel %vm1344_vm5, %v1335_v45, %v2937_v10  ;;  %v795_v10 = vld [vmem:[#allocation2 + $0x19a] sm:$0xff]  ;;  %v424_v42 = vpack.c.bf16 %v405_v35, %v404_v60 }
 0x11a   : > { %v840_v55 = vpop.permute.xlu0 %839  ;;  %v1401_v18 = vsel %vm1377_vm6, %v1368_v11, %v1092_v24 }
 0x11b   : > { %v3011_v6 = vpop.permute.xlu1 %853  ;;  %v1434_v16 = vsel %vm1410_vm7, %v1401_v18, %v1140_v31  ;;  %v1214_v40 = vsel %vm227_vm0, %v417_v49, %v840_v55 }
 0x11c   : > { %1177 = vrot.lane.b32.xlu0 %v2940_v44, %s2416_s26  ;;  %v796_v44 = vld [vmem:[#allocation2 + $0x1a2] sm:$0xff]  ;;  %v1235_v48 = vsel %vm227_vm0, %v424_v42, %v3011_v6 }
 0x11d   : > { %1145 = vrot.lane.b32.xlu1 %v2943_v12, %s2415_s18  ;;  %v812_v12 = vpack.c.bf16 %v796_v44, %v795_v10 }
 0x11e   : > { %v886_v20 = vpop.permute.xlu0 %885 }
 0x11f   : > { %v1188_v21 = vpop.permute.xlu1 %1187 }
 0x120   : > { %v1467_v22 = vsel %vm1443_vm8, %v1434_v16, %v1188_v21  ;;  %1179 = vrot.lane.b32.xlu0 %v804_v32, %s2416_s26  ;;  %v425_v21 = vpack.c.bf16 %v407_v17, %v406_v13 }
 0x121   : > { %1147 = vrot.lane.b32.xlu1 %v764_v50, %s2415_s18  ;;  %2316 = vmatmul.mubr.msk.bf16.gmra.mrb[4].mxu1 %vm1476_vm9, %v1467_v22 }
 0x122   : > { %v888_v4 = vpop.permute.xlu0 %887 }
 0x123   : > { %v3027_v2 = vpop.permute.xlu1 %855  ;;  %v1257_v59 = vsel %vm1245_vm2, %v1214_v40, %v888_v4 }
 0x125   : > { %1193 = vrot.lane.b32.xlu1 %v2961_v52, %s2416_s26  ;;  %v389_v52 = vld [vmem:[#allocation2 + $0x68] sm:$0xff] }
 0x126   : > { %v934_v38 = vpop.permute.xlu0 %933  ;;  %v416_v54 = vpack.c.bf16 %v389_v52, %v388_v19 }
 0x127   : > { %v902_v46 = vpop.permute.xlu1 %901 }
 0x128   : > { %v1211_v34 = vsel %vm227_vm0, %v416_v54, %v2981_v0  ;;  %v1271_v45 = vsel %vm1245_vm2, %v1235_v48, %v902_v46 }
 0x129   : > { %1195 = vrot.lane.b32.xlu1 %v812_v12, %s2416_s26  ;;  %v1255_v47 = vsel %vm1245_vm2, %v1211_v34, %v886_v20 }
 0x12a   : > { %v936_v24 = vpop.permute.xlu0 %935  ;;  %v1288_v57 = vsel %vm1278_vm3, %v1255_v47, %v934_v38 }
 0x12b   : > { %v3032_v62 = vpop.permute.xlu1 %903  ;;  %v1290_v32 = vsel %vm1278_vm3, %v1257_v59, %v936_v24 }
 0x12e   : > { %v982_v56 = vpop.permute.xlu0 %981 }
 0x12f   : > { %v950_v25 = vpop.permute.xlu1 %949  ;;  %v1321_v43 = vsel %vm1311_vm4, %v1288_v57, %v982_v56  ;;  %v1238_v56 = vsel %vm227_vm0, %v425_v21, %v3027_v2 }
 0x130   : > { %v1304_v11 = vsel %vm1278_vm3, %v1271_v45, %v950_v25  ;;  %v1273_v25 = vsel %vm1245_vm2, %v1238_v56, %v3032_v62 }
 0x132   : > { %v984_v26 = vpop.permute.xlu0 %983 }
 0x133   : > { %v952_v28 = vpop.permute.xlu1 %951  ;;  %v1323_v50 = vsel %vm1311_vm4, %v1290_v32, %v984_v26 }
 0x136   : > { %v1030_v63 = vpop.permute.xlu0 %1029 }
 0x137   : > { %v998_v29 = vpop.permute.xlu1 %997  ;;  %v1354_v58 = vsel %vm1344_vm5, %v1321_v43, %v1030_v63  ;;  %v1306_v63 = vsel %vm1278_vm3, %v1273_v25, %v952_v28 }
 0x138   : > { %v1337_v20 = vsel %vm1311_vm4, %v1304_v11, %v998_v29 }
 0x13a   : > { %v1032_v14 = vpop.permute.xlu0 %1031 }
 0x13b   : > { %v1000_v30 = vpop.permute.xlu1 %999  ;;  %v1356_v16 = vsel %vm1344_vm5, %v1323_v50, %v1032_v14 }
 0x13c   : > { %v1339_v14 = vsel %vm1311_vm4, %v1306_v63, %v1000_v30 }
 0x13e   : > { %v1078_v27 = vpop.permute.xlu0 %1077 }
 0x13f   : > { %v1046_v33 = vpop.permute.xlu1 %1045  ;;  %v1387_v61 = vsel %vm1377_vm6, %v1354_v58, %v1078_v27 }
 0x140   : > { %v1370_v6 = vsel %vm1344_vm5, %v1337_v20, %v1046_v33 }
 0x142   : > { %v1080_v39 = vpop.permute.xlu0 %1079 }
 0x143   : > { %v1048_v41 = vpop.permute.xlu1 %1047  ;;  %v1389_v22 = vsel %vm1377_vm6, %v1356_v16, %v1080_v39 }
 0x144   : > { %v1372_v27 = vsel %vm1344_vm5, %v1339_v14, %v1048_v41 }
 0x146   : > { %v1126_v15 = vpop.permute.xlu0 %1125 }
 0x147   : > { %v1094_v31 = vpop.permute.xlu1 %1093  ;;  %v1420_v0 = vsel %vm1410_vm7, %v1387_v61, %v1126_v15 }
 0x148   : > { %v1403_v4 = vsel %vm1377_vm6, %v1370_v6, %v1094_v31 }
 0x14a   : > { %v1128_v3 = vpop.permute.xlu0 %1127 }
 0x14b   : > { %v1096_v5 = vpop.permute.xlu1 %1095  ;;  %v1422_v10 = vsel %vm1410_vm7, %v1389_v22, %v1128_v3 }
 0x14c   : > { %v1405_v33 = vsel %vm1377_vm6, %v1372_v27, %v1096_v5 }
 0x14e   : > { %v1174_v37 = vpop.permute.xlu0 %1173 }
 0x14f   : > { %v1453_v7 = vsel %vm1443_vm8, %v1420_v0, %v1174_v37  ;;  %v1142_v9 = vpop.permute.xlu1 %1141 }
 0x150   : > { %2303 = vmatprep.mubr.msk.bf16.mxu0 %vm1476_vm9, %v1453_v7  ;;  %v1436_v12 = vsel %vm1410_vm7, %v1403_v4, %v1142_v9 }
 0x152   : > { %v842_v55 = vpop.permute.xlu0 %841 }
 0x153   : > { %v1144_v18 = vpop.permute.xlu1 %1143  ;;  %v1217_v61 = vsel %vm227_vm0, %v2747_v53, %v842_v55 }
 0x154   : > { %v1438_v52 = vsel %vm1410_vm7, %v1405_v33, %v1144_v18 }
 0x156   : > { %v1176_v44 = vpop.permute.xlu0 %1175 }
 0x157   : > { %v1455_v38 = vsel %vm1443_vm8, %v1422_v10, %v1176_v44  ;;  %v1190_v46 = vpop.permute.xlu1 %1189 }
 0x158   : > { %v1469_v24 = vsel %vm1443_vm8, %v1436_v12, %v1190_v46  ;;  %2304 = vmatmul.mubr.msk.bf16.gmra.mrb[8].mxu0 %vm1476_vm9, %v1455_v38 }
 0x159   : > { %2319 = vmatprep.mubr.msk.bf16.mxu1 %vm1476_vm9, %v1469_v24 }
 0x15a   : > { %v844_v26 = vpop.permute.xlu0 %843 }
 0x15b   : > { %v858_v29 = vpop.permute.xlu1 %857  ;;  %v1220_v0 = vsel %vm227_vm0, %v2802_v36, %v844_v26 }
 0x15c   : > { %v1241_v18 = vsel %vm227_vm0, %v2764_v1, %v858_v29 }
 0x15e   : > { %v890_v19 = vpop.permute.xlu0 %889 }
 0x15f   : > { %v1192_v39 = vpop.permute.xlu1 %1191  ;;  %v1259_v40 = vsel %vm1245_vm2, %v1217_v61, %v890_v19  ;;  %v3117_v19 = vld [vmem:[%s3233_s2] ss:$0 sm:$0xff] }
 0x160   : > { %v1471_v2 = vsel %vm1443_vm8, %v1438_v52, %v1192_v39 }
 0x161   : > { %2320 = vmatmul.mubr.msk.bf16.gmra.mrb[8].mxu1 %vm1476_vm9, %v1471_v2 }
 0x162   : > { %v892_v54 = vpop.permute.xlu0 %891 }
 0x163   : > { %v860_v62 = vpop.permute.xlu1 %859  ;;  %v1261_v13 = vsel %vm1245_vm2, %v1220_v0, %v892_v54 }
 0x164   : > { %v1244_v12 = vsel %vm227_vm0, %v2848_v51, %v860_v62 }
 0x166   : > { %v938_v15 = vpop.permute.xlu0 %937 }
 0x167   : > { %v906_v8 = vpop.permute.xlu1 %905  ;;  %v1292_v37 = vsel %vm1278_vm3, %v1259_v40, %v938_v15 }
 0x168   : > { %v1275_v16 = vsel %vm1245_vm2, %v1241_v18, %v906_v8 }
 0x16a   : > { %v940_v28 = vpop.permute.xlu0 %939 }
 0x16b   : > { %v908_v23 = vpop.permute.xlu1 %907  ;;  %v1294_v45 = vsel %vm1278_vm3, %v1261_v13, %v940_v28 }
 0x16c   : > { %v1277_v38 = vsel %vm1245_vm2, %v1244_v12, %v908_v23 }
 0x16e   : > { %v986_v31 = vpop.permute.xlu0 %985 }
 0x16f   : > { %v954_v30 = vpop.permute.xlu1 %953  ;;  %v1325_v9 = vsel %vm1311_vm4, %v1292_v37, %v986_v31 }
 0x170   : > { %v1308_v22 = vsel %vm1278_vm3, %v1275_v16, %v954_v30 }
 0x172   : > { %v988_v34 = vpop.permute.xlu0 %987 }
 0x173   : > { %v956_v41 = vpop.permute.xlu1 %955  ;;  %v1327_v55 = vsel %vm1311_vm4, %v1294_v45, %v988_v34 }
 0x174   : > { %v1310_v24 = vsel %vm1278_vm3, %v1277_v38, %v956_v41 }
 0x176   : > { %v1034_v47 = vpop.permute.xlu0 %1033 }
 0x177   : > { %v1002_v49 = vpop.permute.xlu1 %1001  ;;  %v1358_v59 = vsel %vm1344_vm5, %v1325_v9, %v1034_v47 }
 0x178   : > { %v1341_v44 = vsel %vm1311_vm4, %v1308_v22, %v1002_v49 }
 0x17a   : > { %v1036_v60 = vpop.permute.xlu0 %1035 }
 0x17b   : > { %v1004_v35 = vpop.permute.xlu1 %1003  ;;  %v1360_v50 = vsel %vm1344_vm5, %v1327_v55, %v1036_v60 }
 0x17c   : > { %v1343_v26 = vsel %vm1311_vm4, %v1310_v24, %v1004_v35 }
 0x17e   : > { %v1082_v57 = vpop.permute.xlu0 %1081 }
 0x17f   : > { %v1050_v3 = vpop.permute.xlu1 %1049  ;;  %v1391_v17 = vsel %vm1377_vm6, %v1358_v59, %v1082_v57 }
 0x180   : > { %v1374_v1 = vsel %vm1344_vm5, %v1341_v44, %v1050_v3 }
 0x182   : > { %v1084_v43 = vpop.permute.xlu0 %1083 }
 0x183   : > { %v1052_v5 = vpop.permute.xlu1 %1051  ;;  %v1393_v20 = vsel %vm1377_vm6, %v1360_v50, %v1084_v43 }
 0x184   : > { %v1376_v29 = vsel %vm1344_vm5, %v1343_v26, %v1052_v5 }
 0x186   : > { %v1130_v58 = vpop.permute.xlu0 %1129 }
 0x187   : > { %v1098_v42 = vpop.permute.xlu1 %1097  ;;  %v1424_v53 = vsel %vm1410_vm7, %v1391_v17, %v1130_v58 }
 0x188   : > { %v1407_v46 = vsel %vm1377_vm6, %v1374_v1, %v1098_v42 }
 0x18a   : > { %v1132_v7 = vpop.permute.xlu0 %1131 }
 0x18b   : > { %v1100_v48 = vpop.permute.xlu1 %1099  ;;  %v1426_v21 = vsel %vm1410_vm7, %v1393_v20, %v1132_v7 }
 0x18c   : > { %v1409_v51 = vsel %vm1377_vm6, %v1376_v29, %v1100_v48 }
 0x18e   : > { %v1178_v32 = vpop.permute.xlu0 %1177 }
 0x18f   : > { %v1457_v36 = vsel %vm1443_vm8, %v1424_v53, %v1178_v32  ;;  %v1146_v11 = vpop.permute.xlu1 %1145 }
 0x190   : > { %2307 = vmatprep.mubr.msk.bf16.mxu0 %vm1476_vm9, %v1457_v36  ;;  %v1440_v56 = vsel %vm1410_vm7, %v1407_v46, %v1146_v11 }
 0x192   : > { %v1180_v6 = vpop.permute.xlu0 %1179 }
 0x193   : > { %v1459_v4 = vsel %vm1443_vm8, %v1426_v21, %v1180_v6  ;;  %v1148_v10 = vpop.permute.xlu1 %1147 }
 0x194   : > { %2308 = vmatmul.mubr.msk.bf16.gmra.mrb[12].mxu0 %vm1476_vm9, %v1459_v4  ;;  %v1442_v14 = vsel %vm1410_vm7, %v1409_v51, %v1148_v10 }
 0x197   : > { %v1194_v25 = vpop.permute.xlu1 %1193 }
 0x198   : > { %v1473_v63 = vsel %vm1443_vm8, %v1440_v56, %v1194_v25 }
 0x199   : > { %2323 = vmatprep.mubr.msk.bf16.mxu1 %vm1476_vm9, %v1473_v63 }
 0x19b   : > { %v1196_v27 = vpop.permute.xlu1 %1195 }
 0x19c   : > { %v1475_v33 = vsel %vm1443_vm8, %v1442_v14, %v1196_v27 }
 0x19d   : > { %2324 = vmatmul.mubr.msk.bf16.gmra.mrb[12].mxu1 %vm1476_vm9, %v1475_v33 }
 0x1ab   : > { %v2297_v52 = vpop.f32.mrb[0].mxu0 }
 0x1ac   : > { %v1656_v39 = vadd.f32 %v2297_v52, %v3117_v19  ;;  %v1647_v2 = vpop.f32.mrb[1].mxu0 }
 0x1ad   : > { %v1648_v54 = vadd.f32 %v3117_v19, %v1647_v2  ;;  %v2298_v62 = vpop.f32.mrb[2].mxu0 }
 0x1ae   : > { %v1776_v15 = vmax.f32 %v1656_v39, 0.0  ;;  %v1659_v8 = vadd.f32 %v2298_v62, %v3117_v19  ;;  %v1650_v28 = vpop.f32.mrb[3].mxu0 }
 0x1af   : > { %v1774_v23 = vmax.f32 %v1648_v54, 0.0  ;;  %v1651_v31 = vadd.f32 %v3117_v19, %v1650_v28 }
 0x1b0   : > { %v2130_v30 = vpack.c.bf16 %v1776_v15, %v1776_v15  ;;  %v1777_v34 = vmax.f32 %v1659_v8, 0.0 }
 0x1b1   : > { %v2128_v41 = vpack.c.bf16 %v1774_v23, %v1774_v23  ;;  %v1775_v47 = vmax.f32 %v1651_v31, 0.0 }
 0x1b2   : > { %1937 = vst.msk [vmem:[%s3127_s23 + $0x8] sm:$0xf] %vm1934_vm10, %v2130_v30  ;;  %v2131_v49 = vpack.c.bf16 %v1777_v34, %v1777_v34 }
 0x1b3   : > { %1935 = vst.msk [vmem:[%s3127_s23] sm:$0xf] %vm1934_vm10, %v2128_v41  ;;  %v2129_v60 = vpack.c.bf16 %v1775_v47, %v1775_v47 }
 0x1b4   : > { %1938 = vst.msk [vmem:[%s3127_s23 + $0xc] sm:$0xf] %vm1934_vm10, %v2131_v49  ;;  %v2313_v35 = vpop.f32.mrb[0].mxu1 }
 0x1b5   : > { %1936 = vst.msk [vmem:[%s3127_s23 + $0x4] sm:$0xf] %vm1934_vm10, %v2129_v60  ;;  %v1720_v57 = vadd.f32 %v2313_v35, %v3117_v19  ;;  %v1711_v3 = vpop.f32.mrb[1].mxu1 }
 0x1b6   : > { %v1712_v43 = vadd.f32 %v3117_v19, %v1711_v3  ;;  %v2314_v5 = vpop.f32.mrb[2].mxu1 }
 0x1b7   : > { %v1792_v58 = vmax.f32 %v1720_v57, 0.0  ;;  %v1723_v42 = vadd.f32 %v2314_v5, %v3117_v19  ;;  %v1714_v61 = vpop.f32.mrb[3].mxu1 }
 0x1b8   : > { %v1790_v40 = vmax.f32 %v1712_v43, 0.0  ;;  %v1715_v0 = vadd.f32 %v3117_v19, %v1714_v61 }
 0x1b9   : > { %v2146_v37 = vpack.c.bf16 %v1792_v58, %v1792_v58  ;;  %v1793_v7 = vmax.f32 %v1723_v42, 0.0 }
 0x1ba   : > { %v2144_v9 = vpack.c.bf16 %v1790_v40, %v1790_v40  ;;  %v1791_v48 = vmax.f32 %v1715_v0, 0.0 }
 0x1bb   : > { %1953 = vst.msk [vmem:[%s3127_s23 + $0x48] sm:$0xf] %vm1934_vm10, %v2146_v37  ;;  %v2147_v59 = vpack.c.bf16 %v1793_v7, %v1793_v7 }
 0x1bc   : > { %1951 = vst.msk [vmem:[%s3127_s23 + $0x40] sm:$0xf] %vm1934_vm10, %v2144_v9  ;;  %v2145_v13 = vpack.c.bf16 %v1791_v48, %v1791_v48 }
 0x1bd   : > { %1954 = vst.msk [vmem:[%s3127_s23 + $0x4c] sm:$0xf] %vm1934_vm10, %v2147_v59 }
 0x1be   : > { %1952 = vst.msk [vmem:[%s3127_s23 + $0x44] sm:$0xf] %vm1934_vm10, %v2145_v13 }
 0x1eb   : > { %v2301_v17 = vpop.f32.mrb[4].mxu0 }
 0x1ec   : > { %v1672_v45 = vadd.f32 %v2301_v17, %v3117_v19  ;;  %v1663_v53 = vpop.f32.mrb[5].mxu0 }
 0x1ed   : > { %v1664_v32 = vadd.f32 %v3117_v19, %v1663_v53  ;;  %v2302_v55 = vpop.f32.mrb[6].mxu0 }
 0x1ee   : > { %v1780_v36 = vmax.f32 %v1672_v45, 0.0  ;;  %v1675_v11 = vadd.f32 %v2302_v55, %v3117_v19  ;;  %v1666_v50 = vpop.f32.mrb[7].mxu0 }
 0x1ef   : > { %v1778_v18 = vmax.f32 %v1664_v32, 0.0  ;;  %v1667_v20 = vadd.f32 %v3117_v19, %v1666_v50 }
 0x1f0   : > { %v2134_v16 = vpack.c.bf16 %v1780_v36, %v1780_v36  ;;  %v1781_v21 = vmax.f32 %v1675_v11, 0.0 }
 0x1f1   : > { %v2132_v6 = vpack.c.bf16 %v1778_v18, %v1778_v18  ;;  %v1779_v22 = vmax.f32 %v1667_v20, 0.0 }
 0x1f2   : > { %1941 = vst.msk [vmem:[%s3127_s23 + $0x18] sm:$0xf] %vm1934_vm10, %v2134_v16  ;;  %v2135_v4 = vpack.c.bf16 %v1781_v21, %v1781_v21 }
 0x1f3   : > { %1939 = vst.msk [vmem:[%s3127_s23 + $0x10] sm:$0xf] %vm1934_vm10, %v2132_v6  ;;  %v2133_v10 = vpack.c.bf16 %v1779_v22, %v1779_v22 }
 0x1f4   : > { %1942 = vst.msk [vmem:[%s3127_s23 + $0x1c] sm:$0xf] %vm1934_vm10, %v2135_v4  ;;  %v2317_v44 = vpop.f32.mrb[4].mxu1 }
 0x1f5   : > { %1940 = vst.msk [vmem:[%s3127_s23 + $0x14] sm:$0xf] %vm1934_vm10, %v2133_v10  ;;  %v1736_v12 = vadd.f32 %v2317_v44, %v3117_v19  ;;  %v1727_v1 = vpop.f32.mrb[5].mxu1 }
 0x1f6   : > { %v1728_v38 = vadd.f32 %v3117_v19, %v1727_v1  ;;  %v2318_v46 = vpop.f32.mrb[6].mxu1 }
 0x1f7   : > { %v1796_v24 = vmax.f32 %v1736_v12, 0.0  ;;  %v1739_v56 = vadd.f32 %v2318_v46, %v3117_v19  ;;  %v1730_v25 = vpop.f32.mrb[7].mxu1 }
 0x1f8   : > { %v1794_v26 = vmax.f32 %v1728_v38, 0.0  ;;  %v1731_v63 = vadd.f32 %v3117_v19, %v1730_v25 }
 0x1f9   : > { %v2150_v29 = vpack.c.bf16 %v1796_v24, %v1796_v24  ;;  %v1797_v51 = vmax.f32 %v1739_v56, 0.0 }
 0x1fa   : > { %v2148_v14 = vpack.c.bf16 %v1794_v26, %v1794_v26  ;;  %v1795_v27 = vmax.f32 %v1731_v63, 0.0 }
 0x1fb   : > { %1957 = vst.msk [vmem:[%s3127_s23 + $0x58] sm:$0xf] %vm1934_vm10, %v2150_v29  ;;  %v2151_v33 = vpack.c.bf16 %v1797_v51, %v1797_v51 }
 0x1fc   : > { %1955 = vst.msk [vmem:[%s3127_s23 + $0x50] sm:$0xf] %vm1934_vm10, %v2148_v14  ;;  %v2149_v52 = vpack.c.bf16 %v1795_v27, %v1795_v27 }
 0x1fd   : > { %1958 = vst.msk [vmem:[%s3127_s23 + $0x5c] sm:$0xf] %vm1934_vm10, %v2151_v33 }
 0x1fe   : > { %1956 = vst.msk [vmem:[%s3127_s23 + $0x54] sm:$0xf] %vm1934_vm10, %v2149_v52 }
 0x22b   : > { %v2305_v39 = vpop.f32.mrb[8].mxu0 }
 0x22c   : > { %v1688_v2 = vadd.f32 %v2305_v39, %v3117_v19  ;;  %v1679_v54 = vpop.f32.mrb[9].mxu0 }
 0x22d   : > { %v1680_v62 = vadd.f32 %v3117_v19, %v1679_v54  ;;  %v2306_v15 = vpop.f32.mrb[10].mxu0 }
 0x22e   : > { %v1784_v8 = vmax.f32 %v1688_v2, 0.0  ;;  %v1691_v28 = vadd.f32 %v2306_v15, %v3117_v19  ;;  %v1682_v23 = vpop.f32.mrb[11].mxu0 }
 0x22f   : > { %v1782_v31 = vmax.f32 %v1680_v62, 0.0  ;;  %v1683_v30 = vadd.f32 %v3117_v19, %v1682_v23 }
 0x230   : > { %v2138_v34 = vpack.c.bf16 %v1784_v8, %v1784_v8  ;;  %v1785_v41 = vmax.f32 %v1691_v28, 0.0 }
 0x231   : > { %v2136_v47 = vpack.c.bf16 %v1782_v31, %v1782_v31  ;;  %v1783_v49 = vmax.f32 %v1683_v30, 0.0 }
 0x232   : > { %1945 = vst.msk [vmem:[%s3127_s23 + $0x28] sm:$0xf] %vm1934_vm10, %v2138_v34  ;;  %v2139_v60 = vpack.c.bf16 %v1785_v41, %v1785_v41 }
 0x233   : > { %1943 = vst.msk [vmem:[%s3127_s23 + $0x20] sm:$0xf] %vm1934_vm10, %v2136_v47  ;;  %v2137_v35 = vpack.c.bf16 %v1783_v49, %v1783_v49 }
 0x234   : > { %1946 = vst.msk [vmem:[%s3127_s23 + $0x2c] sm:$0xf] %vm1934_vm10, %v2139_v60  ;;  %v2321_v57 = vpop.f32.mrb[8].mxu1 }
 0x235   : > { %1944 = vst.msk [vmem:[%s3127_s23 + $0x24] sm:$0xf] %vm1934_vm10, %v2137_v35  ;;  %v1752_v3 = vadd.f32 %v2321_v57, %v3117_v19  ;;  %v1743_v43 = vpop.f32.mrb[9].mxu1 }
 0x236   : > { %v1744_v5 = vadd.f32 %v3117_v19, %v1743_v43  ;;  %v2322_v58 = vpop.f32.mrb[10].mxu1 }
 0x237   : > { %v1800_v42 = vmax.f32 %v1752_v3, 0.0  ;;  %v1755_v61 = vadd.f32 %v2322_v58, %v3117_v19  ;;  %v1746_v40 = vpop.f32.mrb[11].mxu1 }
 0x238   : > { %v1798_v0 = vmax.f32 %v1744_v5, 0.0  ;;  %v1747_v37 = vadd.f32 %v3117_v19, %v1746_v40 }
 0x239   : > { %v2154_v7 = vpack.c.bf16 %v1800_v42, %v1800_v42  ;;  %v1801_v9 = vmax.f32 %v1755_v61, 0.0 }
 0x23a   : > { %v2152_v48 = vpack.c.bf16 %v1798_v0, %v1798_v0  ;;  %v1799_v59 = vmax.f32 %v1747_v37, 0.0 }
 0x23b   : > { %1961 = vst.msk [vmem:[%s3127_s23 + $0x68] sm:$0xf] %vm1934_vm10, %v2154_v7  ;;  %v2155_v13 = vpack.c.bf16 %v1801_v9, %v1801_v9 }
 0x23c   : > { %1959 = vst.msk [vmem:[%s3127_s23 + $0x60] sm:$0xf] %vm1934_vm10, %v2152_v48  ;;  %v2153_v17 = vpack.c.bf16 %v1799_v59, %v1799_v59 }
 0x23d   : > { %1962 = vst.msk [vmem:[%s3127_s23 + $0x6c] sm:$0xf] %vm1934_vm10, %v2155_v13 }
 0x23e   : > { %1960 = vst.msk [vmem:[%s3127_s23 + $0x64] sm:$0xf] %vm1934_vm10, %v2153_v17 }
 0x267   : > { %v2309_v45 = vpop.f32.mrb[12].mxu0 }
 0x268   : > { %v1704_v53 = vadd.f32 %v2309_v45, %v3117_v19  ;;  %v1695_v32 = vpop.f32.mrb[13].mxu0 }
 0x269   : > { %v1696_v55 = vadd.f32 %v3117_v19, %v1695_v32  ;;  %v2310_v36 = vpop.f32.mrb[14].mxu0 }
 0x26a   : > { %v1788_v11 = vmax.f32 %v1704_v53, 0.0  ;;  %v1707_v50 = vadd.f32 %v2310_v36, %v3117_v19  ;;  %v1698_v18 = vpop.f32.mrb[15].mxu0 }
 0x26b   : > { %v1786_v20 = vmax.f32 %v1696_v55, 0.0  ;;  %v1699_v16 = vadd.f32 %v3117_v19, %v1698_v18 }
 0x26c   : > { %v2142_v21 = vpack.c.bf16 %v1788_v11, %v1788_v11  ;;  %v1789_v6 = vmax.f32 %v1707_v50, 0.0 }
 0x26d   : > { %v2140_v22 = vpack.c.bf16 %v1786_v20, %v1786_v20  ;;  %v1787_v4 = vmax.f32 %v1699_v16, 0.0 }
 0x26e   : > { %1949 = vst.msk [vmem:[%s3127_s23 + $0x38] sm:$0xf] %vm1934_vm10, %v2142_v21  ;;  %v2143_v10 = vpack.c.bf16 %v1789_v6, %v1789_v6 }
 0x26f   : > { %1947 = vst.msk [vmem:[%s3127_s23 + $0x30] sm:$0xf] %vm1934_vm10, %v2140_v22  ;;  %v2141_v44 = vpack.c.bf16 %v1787_v4, %v1787_v4 }
 0x270   : > { %1950 = vst.msk [vmem:[%s3127_s23 + $0x3c] sm:$0xf] %vm1934_vm10, %v2143_v10  ;;  %v2325_v12 = vpop.f32.mrb[12].mxu1 }
 0x271   : > { %1948 = vst.msk [vmem:[%s3127_s23 + $0x34] sm:$0xf] %vm1934_vm10, %v2141_v44  ;;  %v1768_v1 = vadd.f32 %v2325_v12, %v3117_v19  ;;  %v1759_v38 = vpop.f32.mrb[13].mxu1 }
 0x272   : > { %v1760_v46 = vadd.f32 %v3117_v19, %v1759_v38  ;;  %v2326_v24 = vpop.f32.mrb[14].mxu1 }
 0x273   : > { %v1804_v56 = vmax.f32 %v1768_v1, 0.0  ;;  %v1771_v25 = vadd.f32 %v2326_v24, %v3117_v19  ;;  %v1762_v26 = vpop.f32.mrb[15].mxu1 }
 0x274   : > { %v1802_v63 = vmax.f32 %v1760_v46, 0.0  ;;  %v1763_v29 = vadd.f32 %v3117_v19, %v1762_v26 }
 0x275   : > { %v2158_v51 = vpack.c.bf16 %v1804_v56, %v1804_v56  ;;  %v1805_v14 = vmax.f32 %v1771_v25, 0.0 }
 0x276   : > { %v2156_v27 = vpack.c.bf16 %v1802_v63, %v1802_v63  ;;  %v1803_v33 = vmax.f32 %v1763_v29, 0.0 }
 0x277   : > { %1965 = vst.msk [vmem:[%s3127_s23 + $0x78] sm:$0xf] %vm1934_vm10, %v2158_v51  ;;  %v2159_v52 = vpack.c.bf16 %v1805_v14, %v1805_v14 }
 0x278   : > { %1963 = vst.msk [vmem:[%s3127_s23 + $0x70] sm:$0xf] %vm1934_vm10, %v2156_v27  ;;  %v2157_v39 = vpack.c.bf16 %v1803_v33, %v1803_v33 }
 0x279   : > { %1966 = vst.msk [vmem:[%s3127_s23 + $0x7c] sm:$0xf] %vm1934_vm10, %v2159_v52 }
 0x27a   : > { %1964 = vst.msk [vmem:[%s3127_s23 + $0x74] sm:$0xf] %vm1934_vm10, %v2157_v39 }
 0x27b PF: > { %s13_s14 = sadd.s32 1, %s2406_s14   ;;  %s3235_s12 = smov %s2402_s13 }
 0x27c   : > { %p10_p5 = scmp.ge.s32.totalorder %s13_s14, 4   ;;  %s3236_s13 = smov %s3238_s15 }
 0x27e   :  { %12 = sbr.rel (!%p10_p5) target bundleno = 2 (0x2), region = 74 }

</bundles_post_ra>
